<compile_context>
chip_gen: v6e
topology: v6e:2x2x1
jax: 0.10.0
libtpu: 0.0.40
codegen_flags: <defaults>
</compile_context>

<pallas_src>
import jax
import jax.numpy as jnp
import numpy as np
from jax.experimental import pallas as pl
from jax.experimental.pallas import tpu as pltpu


def _pick_block_rows(rows):
    """Rows of 128 anchors per grid step.

    Must be a multiple of 8 (sublane tiling) or equal to the full extent.
    Prefer >=2 grid steps (megacore on v7x) and <=32 rows per step (vreg
    pressure / per-step overhead trade-off).
    """
    if rows <= 8 or rows % 8 != 0:
        return rows
    for rb in (32, 16, 8):
        if rows % rb == 0 and rows // rb >= 2:
            return rb
    return 8


def fold_per_anchor(x):
    """(N, C) -> lane-dense folded (C, N//128, 128)."""
    n, c = x.shape
    return x.T.reshape(c, n // 128, 128)


# ---------------------------------------------------------------------------
# Kernel A: IoU kept in registers, processed in (G, 128) column chunks.
# Outputs (already in the folded layout kernel B consumes):
#   amax (rows,128) f32, aarg (rows,128) i32  -- per-anchor max / argmax-gt
#   gmax (G, T*128) f32, garg (G, T*128) i32  -- per-gt per-tile max / argmax
# ---------------------------------------------------------------------------
def iou_kernel(gts_ref, anc_ref, amax_ref, aarg_ref, gmax_ref, garg_ref):
    gt = gts_ref[...]                                   # (G, 4) VMEM resident
    gnum = gt.shape[0]
    rb = amax_ref.shape[0]                              # rows in this block

    gx1 = gt[:, 0:1]
    gy1 = gt[:, 1:2]
    gx2 = gt[:, 2:3]
    gy2 = gt[:, 3:4]                                    # (G, 1)
    area_g = (gx2 - gx1) * (gy2 - gy1)                  # (G, 1)

    iota_g = jax.lax.broadcasted_iota(jnp.int32, (gnum, 1), 0)
    iota_l = jax.lax.broadcasted_iota(jnp.int32, (1, 128), 1)
    base = pl.program_id(0) * (rb * 128)

    x1_ref = anc_ref.at[0]
    y1_ref = anc_ref.at[1]
    x2_ref = anc_ref.at[2]
    y2_ref = anc_ref.at[3]                              # (rb, 128) views

    run_max = jnp.full((gnum, 1), -1.0, jnp.float32)
    run_arg = jnp.zeros((gnum, 1), jnp.int32)

    r0 = 0
    while r0 < rb:                                      # static, <=8-row groups
        gsz = min(8, rb - r0)
        amax_rows = []
        aarg_rows = []
        for rr in range(r0, r0 + gsz):
            ax1 = x1_ref[rr:rr + 1, :]                  # (1, 128)
            ay1 = y1_ref[rr:rr + 1, :]
            ax2 = x2_ref[rr:rr + 1, :]
            ay2 = y2_ref[rr:rr + 1, :]

            iw = jnp.maximum(jnp.minimum(ax2, gx2) - jnp.maximum(ax1, gx1), 0.0)
            ih = jnp.maximum(jnp.minimum(ay2, gy2) - jnp.maximum(ay1, gy1), 0.0)
            inter = iw * ih                             # (G, 128)
            area_a = (ax2 - ax1) * (ay2 - ay1)          # (1, 128)
            # NaN guard for degenerate boxes; exact otherwise (ref has no clamp)
            union = jnp.maximum(area_a + area_g - inter, 1e-12)
            iou = inter / union                         # (G, 128)

            # per-anchor max over gts + first-index argmax
            amax = jnp.max(iou, axis=0, keepdims=True)                  # (1,128)
            aarg = jnp.min(jnp.where(iou >= amax, iota_g, gnum),
                           axis=0, keepdims=True)                       # (1,128)
            amax_rows.append(amax)
            aarg_rows.append(aarg)

            # per-gt running max over this block's anchors (first index on ties)
            cmax = jnp.max(iou, axis=1, keepdims=True)                  # (G,1)
            carg = jnp.min(jnp.where(iou >= cmax, iota_l, 128),
                           axis=1, keepdims=True) + (base + rr * 128)
            upd = cmax > run_max
            run_arg = jnp.where(upd, carg, run_arg)
            run_max = jnp.where(upd, cmax, run_max)

        amax_ref[r0:r0 + gsz, :] = jnp.concatenate(amax_rows, axis=0)
        aarg_ref[r0:r0 + gsz, :] = jnp.concatenate(aarg_rows, axis=0)
        r0 += gsz

    gmax_ref[...] = jnp.broadcast_to(run_max, (gnum, 128))
    garg_ref[...] = jnp.broadcast_to(run_arg, (gnum, 128))


# ---------------------------------------------------------------------------
# Kernel B: weighted 2-class cross-entropy + box encode + smooth-L1 partials.
# All math on dense (<=8, 128) tiles; gts are read as scalars from SMEM for
# the (tiny) matched-gt gather.  Per-tile partial sums land in an (8, 128)
# lane-dense block (lanes 0/1/2 of row 0).
# ---------------------------------------------------------------------------
def loss_kernel(gts_ref, score_ref, reg_ref, anc_ref, aarg_ref, sel_ref, out_ref):
    gnum = gts_ref.shape[0]
    rb = sel_ref.shape[0]

    s0_ref = score_ref.at[0]
    s1_ref = score_ref.at[1]
    pdx_ref = reg_ref.at[0]
    pdy_ref = reg_ref.at[1]
    pdw_ref = reg_ref.at[2]
    pdh_ref = reg_ref.at[3]
    ax1_ref = anc_ref.at[0]
    ay1_ref = anc_ref.at[1]
    ax2_ref = anc_ref.at[2]
    ay2_ref = anc_ref.at[3]

    pos_cls = jnp.zeros((1, 1), jnp.float32)
    neg_cls = jnp.zeros((1, 1), jnp.float32)
    reg_sum = jnp.zeros((1, 1), jnp.float32)

    def sl1(t):
        a = jnp.abs(t)
        return jnp.where(a < 1.0, 0.5 * a * a, a - 0.5)

    r0 = 0
    while r0 < rb:                                      # static, <=8-row groups
        gsz = min(8, rb - r0)
        rs = slice(r0, r0 + gsz)

        sel = sel_ref[rs, :]                            # +1 pos / -1 neg / 0
        posw = jnp.maximum(sel, 0.0)
        negw = jnp.maximum(-sel, 0.0)

        # two-class CE via shared softplus: lse-s0 = softplus(d), lse-s1 = softplus(-d)
        d = s1_ref[rs, :] - s0_ref[rs, :]
        sp = jnp.log(1.0 + jnp.exp(-jnp.abs(d)))
        pos_cls = pos_cls + jnp.sum(posw * (jnp.maximum(d, 0.0) + sp), keepdims=True)
        neg_cls = neg_cls + jnp.sum(negw * (jnp.maximum(-d, 0.0) + sp), keepdims=True)

        # matched-gt gather (G tiny): one-hot accumulate with SMEM scalars
        aarg = aarg_ref[rs, :]
        gx1 = jnp.zeros_like(sel)
        gy1 = jnp.zeros_like(sel)
        gx2 = jnp.zeros_like(sel)
        gy2 = jnp.zeros_like(sel)
        for g in range(gnum):
            m = (aarg == g).astype(jnp.float32)
            gx1 = gx1 + m * gts_ref[g, 0]
            gy1 = gy1 + m * gts_ref[g, 1]
            gx2 = gx2 + m * gts_ref[g, 2]
            gy2 = gy2 + m * gts_ref[g, 3]

        ax1 = ax1_ref[rs, :]
        ay1 = ay1_ref[rs, :]
        ax2 = ax2_ref[rs, :]
        ay2 = ay2_ref[rs, :]
        aw = ax2 - ax1
        ah = ay2 - ay1
        pos = posw > 0.0
        # guard degenerate anchors: avoids 0*inf = NaN poisoning the masked sum
        inv_aw = pl.reciprocal(jnp.where(pos, aw, 1.0))
        inv_ah = pl.reciprocal(jnp.where(pos, ah, 1.0))
        acx = ax1 + aw * 0.5
        acy = ay1 + ah * 0.5
        gw = gx2 - gx1
        gh = gy2 - gy1
        gcx = gx1 + gw * 0.5
        gcy = gy1 + gh * 0.5
        dx = (gcx - acx) * inv_aw
        dy = (gcy - acy) * inv_ah
        dw = jnp.log(jnp.where(pos, gw * inv_aw, 1.0))
        dh = jnp.log(jnp.where(pos, gh * inv_ah, 1.0))

        per_anchor = (sl1(pdx_ref[rs, :] - dx) + sl1(pdy_ref[rs, :] - dy)
                      + sl1(pdw_ref[rs, :] - dw) + sl1(pdh_ref[rs, :] - dh))
        reg_sum = reg_sum + jnp.sum(posw * per_anchor, keepdims=True)
        r0 += gsz

    lane = jax.lax.broadcasted_iota(jnp.int32, (8, 128), 1)
    sub = jax.lax.broadcasted_iota(jnp.int32, (8, 128), 0)
    row0 = sub == 0
    out_ref[...] = jnp.where(row0 & (lane == 0), pos_cls,
                   jnp.where(row0 & (lane == 1), neg_cls,
                   jnp.where(row0 & (lane == 2), reg_sum, 0.0)))


# ---------------------------------------------------------------------------
# Wrapper: heavy math in kernels, index-only sampling in plain JAX.
# `anchors_folded` is the static (4, rows, 128) lane-major fold (hoisted).
# ---------------------------------------------------------------------------
def anchor_target_layer(score_pred, reg_pred, anchors_folded, gts,
                        sample_max_num=256, neg_thr=0.3, pos_thr=0.5,
                        np_rate=0.5):
    _, rows, _ = anchors_folded.shape
    N = rows * 128
    G = gts.shape[0]
    RB = _pick_block_rows(rows)
    T = rows // RB

    gts_f = gts.astype(jnp.float32)
    anc_f = anchors_folded.astype(jnp.float32)
    score_f = fold_per_anchor(score_pred.astype(jnp.float32))   # (2, rows, 128)
    reg_f = fold_per_anchor(reg_pred.astype(jnp.float32))       # (4, rows, 128)

    amax, aarg, gmax_part, garg_part = pl.pallas_call(
        iou_kernel,
        out_shape=(jax.ShapeDtypeStruct((rows, 128), jnp.float32),
                   jax.ShapeDtypeStruct((rows, 128), jnp.int32),
                   jax.ShapeDtypeStruct((G, T * 128), jnp.float32),
                   jax.ShapeDtypeStruct((G, T * 128), jnp.int32)),
        grid=(T,),
        in_specs=[pl.BlockSpec((G, 4), lambda i: (0, 0)),
                  pl.BlockSpec((4, RB, 128), lambda i: (0, i, 0))],
        out_specs=(pl.BlockSpec((RB, 128), lambda i: (i, 0)),
                   pl.BlockSpec((RB, 128), lambda i: (i, 0)),
                   pl.BlockSpec((G, 128), lambda i: (0, i)),
                   pl.BlockSpec((G, 128), lambda i: (0, i))),
        compiler_params=pltpu.CompilerParams(
            dimension_semantics=("parallel",)),
    )(gts_f, anc_f)

    # combine per-tile gt-side partials (first-index tie rule preserved)
    gmax_tiles = gmax_part[:, ::128]                  # (G, T)
    garg_tiles = garg_part[:, ::128]                  # (G, T)
    best_tile = jnp.argmax(gmax_tiles, axis=1)
    gt_argmax = jnp.take_along_axis(garg_tiles, best_tile[:, None], axis=1)[:, 0]

    # ---- sampling logic (index bookkeeping only) -> plain JAX -------------
    amax_v = amax.reshape(N)
    pos_mask = amax_v > pos_thr
    pos_mask = pos_mask.at[gt_argmax].set(True)
    neg_mask = amax_v < neg_thr
    neg_mask = neg_mask.at[gt_argmax].set(False)

    pos_total = jnp.sum(pos_mask.astype(jnp.int32))
    pos_upper = int(sample_max_num * np_rate)
    neg_bound_default = int(sample_max_num * (1.0 - np_rate))
    neg_bound = jnp.where(
        pos_total < pos_upper,
        jnp.floor(pos_total.astype(jnp.float32) / np_rate
                  * (1.0 - np_rate)).astype(jnp.int32),
        jnp.int32(neg_bound_default))
    pos_used = jnp.minimum(pos_total, pos_upper)

    pos_i = pos_mask.astype(jnp.int32)
    neg_i = neg_mask.astype(jnp.int32)
    pos_rank = jnp.cumsum(pos_i) - pos_i
    neg_rank = jnp.cumsum(neg_i) - neg_i
    pos_sel = pos_mask & (pos_rank < pos_upper)
    neg_sel = neg_mask & (neg_rank < neg_bound)
    neg_used = jnp.sum(neg_sel.astype(jnp.int32))

    # single selection stream: +1 positive, -1 negative, 0 ignore
    sel = (pos_sel.astype(jnp.float32)
           - neg_sel.astype(jnp.float32)).reshape(rows, 128)

    part = pl.pallas_call(
        loss_kernel,
        out_shape=jax.ShapeDtypeStruct((8 * T, 128), jnp.float32),
        grid=(T,),
        in_specs=[pl.BlockSpec(memory_space=pltpu.MemorySpace.SMEM),    # gts
                  pl.BlockSpec((2, RB, 128), lambda i: (0, i, 0)),      # score
                  pl.BlockSpec((4, RB, 128), lambda i: (0, i, 0)),      # reg
                  pl.BlockSpec((4, RB, 128), lambda i: (0, i, 0)),      # anchors
                  pl.BlockSpec((RB, 128), lambda i: (i, 0)),            # aarg
                  pl.BlockSpec((RB, 128), lambda i: (i, 0))],           # sel
        out_specs=pl.BlockSpec((8, 128), lambda i: (i, 0)),
        compiler_params=pltpu.CompilerParams(
            dimension_semantics=("parallel",)),
    )(gts_f, score_f, reg_f, anc_f, aarg, sel)

    pos_cls_sum = jnp.sum(part[:, 0])
    neg_cls_sum = jnp.sum(part[:, 1])
    reg_sum = jnp.sum(part[:, 2])

    # divide-by-zero guards (empty positive/negative sets)
    pos_used_f = jnp.maximum(pos_used, 1).astype(jnp.float32)
    neg_used_f = jnp.maximum(neg_used, 1).astype(jnp.float32)
    return (pos_cls_sum / pos_used_f + reg_sum / pos_used_f
            + neg_cls_sum / neg_used_f)


# ---------------------------------------------------------------------------
# Pure NumPy reference (mirrors the PyTorch forward semantics)
# ---------------------------------------------------------------------------
def reference_loss(score_pred, reg_pred, anchors, gts, sample_max_num=256,
                   neg_thr=0.3, pos_thr=0.5, np_rate=0.5):
    ax1, ay1, ax2, ay2 = [anchors[:, k:k + 1] for k in range(4)]
    gx1, gy1, gx2, gy2 = [gts[None, :, k] for k in range(4)]
    ix1 = np.maximum(ax1, gx1); iy1 = np.maximum(ay1, gy1)
    ix2 = np.minimum(ax2, gx2); iy2 = np.minimum(ay2, gy2)
    iw = np.maximum(ix2 - ix1, 0.0); ih = np.maximum(iy2 - iy1, 0.0)
    inter = iw * ih
    area_a = (ax2 - ax1) * (ay2 - ay1)
    area_g = (gx2 - gx1) * (gy2 - gy1)
    iou = inter / (area_a + area_g - inter)

    anchor_max = iou.max(1)
    anchor_arg = iou.argmax(1)
    gt_arg = iou.argmax(0)

    pos_mask = anchor_max > pos_thr
    pos_mask[gt_arg] = True
    neg_mask = anchor_max < neg_thr
    neg_mask[gt_arg] = False
    pos_idx = np.nonzero(pos_mask)[0]
    neg_idx = np.nonzero(neg_mask)[0]

    pos_upper = int(sample_max_num * np_rate)
    neg_bound = int(sample_max_num * (1.0 - np_rate))
    if len(pos_idx) < pos_upper:
        neg_bound = int(float(len(pos_idx)) / np_rate * (1.0 - np_rate))
    else:
        pos_idx = pos_idx[:pos_upper]
    if neg_bound < len(neg_idx):
        neg_idx = neg_idx[:neg_bound]

    def ce(logits, cls):
        m = logits.max(1)
        lse = m + np.log(np.exp(logits - m[:, None]).sum(1))
        return (lse - logits[:, cls]).mean()

    pos_cls = ce(score_pred[pos_idx], 0)
    neg_cls = ce(score_pred[neg_idx], 1)

    reg = 0.0
    for i in pos_idx:
        a = anchors[i]
        g = gts[anchor_arg[i]]
        aw = a[2] - a[0]; ah = a[3] - a[1]
        acx = a[0] + aw / 2.0; acy = a[1] + ah / 2.0
        gw = g[2] - g[0]; gh = g[3] - g[1]
        gcx = g[0] + gw / 2.0; gcy = g[1] + gh / 2.0
        t = np.array([(gcx - acx) / aw, (gcy - acy) / ah,
                      np.log(gw / aw), np.log(gh / ah)])
        d = np.abs(reg_pred[i] - t)
        reg += np.where(d < 1.0, 0.5 * d * d, d - 0.5).sum()
    reg = reg / float(len(pos_idx))
    return pos_cls + reg + neg_cls


if __name__ == "__main__":
    key = jax.random.PRNGKey(0)
    k1, k2, k3, k4, k5 = jax.random.split(key, 5)

    N, G = 512, 8
    # valid anchor boxes on a 256x256 "image"
    ctr = jax.random.uniform(k1, (N, 2), minval=32.0, maxval=224.0)
    wh = jax.random.uniform(k2, (N, 2), minval=16.0, maxval=96.0)
    anchors = jnp.concatenate([ctr - wh / 2, ctr + wh / 2], axis=1).astype(jnp.float32)

    # ground truths: jittered copies of the first G anchors (so positives exist)
    gctr = ctr[:G] + jax.random.uniform(k3, (G, 2), minval=-4.0, maxval=4.0)
    gwh = wh[:G] * jax.random.uniform(k3, (G, 2), minval=0.9, maxval=1.1)
    gts = jnp.concatenate([gctr - gwh / 2, gctr + gwh / 2], axis=1).astype(jnp.float32)

    score_pred = jax.random.normal(k4, (N, 2), dtype=jnp.float32)
    reg_pred = jax.random.normal(k5, (N, 4), dtype=jnp.float32)

    # anchors are static for an RPN: fold to lane-major once, outside jit
    anchors_folded = fold_per_anchor(anchors)          # (4, N//128, 128)

    loss = jax.jit(anchor_target_layer)(score_pred, reg_pred, anchors_folded, gts)
    loss = jax.block_until_ready(loss)

    ref = reference_loss(np.asarray(score_pred), np.asarray(reg_pred),
                         np.asarray(anchors), np.asarray(gts))
    assert np.isfinite(float(loss)), "loss is not finite"
    np.testing.assert_allclose(float(loss), float(ref), rtol=2e-3, atol=2e-3)
    print("KERNEL_OK")
</pallas_src>

<mosaic_0001>
module attributes {stable_mosaic.version = 11 : i64} {
  func.func @iou_kernel(%arg0: i32, %arg1: memref<8x4xf32, #tpu.memory_space<vmem>>, %arg2: memref<4x4x128xf32, #tpu.memory_space<vmem>>, %arg3: memref<4x128xf32, #tpu.memory_space<vmem>>, %arg4: memref<4x128xi32, #tpu.memory_space<vmem>>, %arg5: memref<8x128xf32, #tpu.memory_space<vmem>>, %arg6: memref<8x128xi32, #tpu.memory_space<vmem>>) attributes {dimension_semantics = [#tpu.dimension_semantics<parallel>], iteration_bounds = array<i64: 1>, scalar_prefetch = 0 : i64, scratch_operands = 0 : i64, tpu.core_type = #tpu.core_type<tc>, window_params = [{pipeline_mode = #tpu.pipeline_mode<synchronous>, transform_indices = @transform_0, window_bounds = array<i64: 8, 4>}, {transform_indices = @transform_1, window_bounds = array<i64: 4, 4, 128>}, {transform_indices = @transform_2, window_bounds = array<i64: 4, 128>}, {transform_indices = @transform_3, window_bounds = array<i64: 4, 128>}, {transform_indices = @transform_4, window_bounds = array<i64: 8, 128>}, {transform_indices = @transform_5, window_bounds = array<i64: 8, 128>}]} {
    %c0 = arith.constant 0 : index
    %c0_0 = arith.constant 0 : index
    %0 = vector.load %arg1[%c0, %c0_0] : memref<8x4xf32, #tpu.memory_space<vmem>>, vector<8x4xf32>
    %1 = vector.extract_strided_slice %0 {offsets = [0, 0], sizes = [8, 1], strides = [1, 1]} : vector<8x4xf32> to vector<8x1xf32>
    %2 = vector.extract_strided_slice %0 {offsets = [0, 1], sizes = [8, 1], strides = [1, 1]} : vector<8x4xf32> to vector<8x1xf32>
    %3 = vector.extract_strided_slice %0 {offsets = [0, 2], sizes = [8, 1], strides = [1, 1]} : vector<8x4xf32> to vector<8x1xf32>
    %4 = vector.extract_strided_slice %0 {offsets = [0, 3], sizes = [8, 1], strides = [1, 1]} : vector<8x4xf32> to vector<8x1xf32>
    %5 = arith.subf %3, %1 : vector<8x1xf32>
    %6 = arith.subf %4, %2 : vector<8x1xf32>
    %7 = arith.mulf %5, %6 : vector<8x1xf32>
    %8 = tpu.iota {dimensions = array<i32: 0>} : vector<8x1xi32>
    %9 = tpu.iota {dimensions = array<i32: 1>} : vector<1x128xi32>
    %c512_i32 = arith.constant 512 : i32
    %10 = arith.muli %arg0, %c512_i32 : i32
    %cst = arith.constant -1.000000e+00 : f32
    %11 = vector.broadcast %cst : f32 to vector<8x1xf32>
    %c0_i32 = arith.constant 0 : i32
    %12 = vector.broadcast %c0_i32 : i32 to vector<8x1xi32>
    %c0_i32_1 = arith.constant 0 : i32
    %c0_i32_2 = arith.constant 0 : i32
    %c0_i32_3 = arith.constant 0 : i32
    %13 = tpu.memref_slice %arg2[%c0_i32_1, %c0_i32_2, %c0_i32_3] : memref<4x4x128xf32, #tpu.memory_space<vmem>> -> memref<1x4x128xf32, #tpu.memory_space<vmem>>
    %14 = tpu.memref_squeeze %13 : memref<1x4x128xf32, #tpu.memory_space<vmem>> -> memref<4x128xf32, #tpu.memory_space<vmem>>
    %c0_4 = arith.constant 0 : index
    %c0_5 = arith.constant 0 : index
    %15 = vector.load %14[%c0_4, %c0_5] : memref<4x128xf32, #tpu.memory_space<vmem>>, vector<1x128xf32>
    %c1_i32 = arith.constant 1 : i32
    %c0_i32_6 = arith.constant 0 : i32
    %c0_i32_7 = arith.constant 0 : i32
    %16 = tpu.memref_slice %arg2[%c1_i32, %c0_i32_6, %c0_i32_7] : memref<4x4x128xf32, #tpu.memory_space<vmem>> -> memref<1x4x128xf32, #tpu.memory_space<vmem>>
    %17 = tpu.memref_squeeze %16 : memref<1x4x128xf32, #tpu.memory_space<vmem>> -> memref<4x128xf32, #tpu.memory_space<vmem>>
    %c0_8 = arith.constant 0 : index
    %c0_9 = arith.constant 0 : index
    %18 = vector.load %17[%c0_8, %c0_9] : memref<4x128xf32, #tpu.memory_space<vmem>>, vector<1x128xf32>
    %c2_i32 = arith.constant 2 : i32
    %c0_i32_10 = arith.constant 0 : i32
    %c0_i32_11 = arith.constant 0 : i32
    %19 = tpu.memref_slice %arg2[%c2_i32, %c0_i32_10, %c0_i32_11] : memref<4x4x128xf32, #tpu.memory_space<vmem>> -> memref<1x4x128xf32, #tpu.memory_space<vmem>>
    %20 = tpu.memref_squeeze %19 : memref<1x4x128xf32, #tpu.memory_space<vmem>> -> memref<4x128xf32, #tpu.memory_space<vmem>>
    %c0_12 = arith.constant 0 : index
    %c0_13 = arith.constant 0 : index
    %21 = vector.load %20[%c0_12, %c0_13] : memref<4x128xf32, #tpu.memory_space<vmem>>, vector<1x128xf32>
    %c3_i32 = arith.constant 3 : i32
    %c0_i32_14 = arith.constant 0 : i32
    %c0_i32_15 = arith.constant 0 : i32
    %22 = tpu.memref_slice %arg2[%c3_i32, %c0_i32_14, %c0_i32_15] : memref<4x4x128xf32, #tpu.memory_space<vmem>> -> memref<1x4x128xf32, #tpu.memory_space<vmem>>
    %23 = tpu.memref_squeeze %22 : memref<1x4x128xf32, #tpu.memory_space<vmem>> -> memref<4x128xf32, #tpu.memory_space<vmem>>
    %c0_16 = arith.constant 0 : index
    %c0_17 = arith.constant 0 : index
    %24 = vector.load %23[%c0_16, %c0_17] : memref<4x128xf32, #tpu.memory_space<vmem>>, vector<1x128xf32>
    %25 = vector.broadcast %21 : vector<1x128xf32> to vector<8x128xf32>
    %26 = vector.broadcast %3 : vector<8x1xf32> to vector<8x128xf32>
    %27 = arith.minimumf %25, %26 : vector<8x128xf32>
    %28 = vector.broadcast %15 : vector<1x128xf32> to vector<8x128xf32>
    %29 = vector.broadcast %1 : vector<8x1xf32> to vector<8x128xf32>
    %30 = arith.maximumf %28, %29 : vector<8x128xf32>
    %31 = arith.subf %27, %30 : vector<8x128xf32>
    %cst_18 = arith.constant 0.000000e+00 : f32
    %32 = vector.broadcast %cst_18 : f32 to vector<8x128xf32>
    %33 = arith.maximumf %31, %32 : vector<8x128xf32>
    %34 = vector.broadcast %24 : vector<1x128xf32> to vector<8x128xf32>
    %35 = vector.broadcast %4 : vector<8x1xf32> to vector<8x128xf32>
    %36 = arith.minimumf %34, %35 : vector<8x128xf32>
    %37 = vector.broadcast %18 : vector<1x128xf32> to vector<8x128xf32>
    %38 = vector.broadcast %2 : vector<8x1xf32> to vector<8x128xf32>
    %39 = arith.maximumf %37, %38 : vector<8x128xf32>
    %40 = arith.subf %36, %39 : vector<8x128xf32>
    %cst_19 = arith.constant 0.000000e+00 : f32
    %41 = vector.broadcast %cst_19 : f32 to vector<8x128xf32>
    %42 = arith.maximumf %40, %41 : vector<8x128xf32>
    %43 = arith.mulf %33, %42 : vector<8x128xf32>
    %44 = arith.subf %21, %15 : vector<1x128xf32>
    %45 = arith.subf %24, %18 : vector<1x128xf32>
    %46 = arith.mulf %44, %45 : vector<1x128xf32>
    %47 = vector.broadcast %46 : vector<1x128xf32> to vector<8x128xf32>
    %48 = vector.broadcast %7 : vector<8x1xf32> to vector<8x128xf32>
    %49 = arith.addf %47, %48 : vector<8x128xf32>
    %50 = arith.subf %49, %43 : vector<8x128xf32>
    %cst_20 = arith.constant 9.99999996E-13 : f32
    %51 = vector.broadcast %cst_20 : f32 to vector<8x128xf32>
    %52 = arith.maximumf %50, %51 : vector<8x128xf32>
    %53 = arith.divf %43, %52 : vector<8x128xf32>
    %cst_21 = arith.constant dense<0xFF800000> : vector<128xf32>
    %54 = vector.multi_reduction <maximumf>, %53, %cst_21 [0] : vector<8x128xf32> to vector<128xf32>
    %55 = vector.shape_cast %54 : vector<128xf32> to vector<1x128xf32>
    %56 = vector.broadcast %55 : vector<1x128xf32> to vector<8x128xf32>
    %57 = arith.cmpf oge, %53, %56 : vector<8x128xf32>
    %c8_i32 = arith.constant 8 : i32
    %58 = vector.shape_cast %8 : vector<8x1xi32> to vector<8x1xi32>
    %59 = vector.broadcast %58 : vector<8x1xi32> to vector<8x128xi32>
    %60 = vector.broadcast %c8_i32 : i32 to vector<8x128xi32>
    %61 = arith.select %57, %59, %60 : vector<8x128xi1>, vector<8x128xi32>
    %cst_22 = arith.constant dense<2147483647> : vector<128xi32>
    %62 = vector.multi_reduction <minsi>, %61, %cst_22 [0] : vector<8x128xi32> to vector<128xi32>
    %63 = vector.shape_cast %62 : vector<128xi32> to vector<1x128xi32>
    %cst_23 = arith.constant dense<0xFF800000> : vector<8xf32>
    %64 = vector.multi_reduction <maximumf>, %53, %cst_23 [1] : vector<8x128xf32> to vector<8xf32>
    %65 = vector.shape_cast %64 : vector<8xf32> to vector<8x1xf32>
    %66 = vector.broadcast %65 : vector<8x1xf32> to vector<8x128xf32>
    %67 = arith.cmpf oge, %53, %66 : vector<8x128xf32>
    %c128_i32 = arith.constant 128 : i32
    %68 = vector.shape_cast %9 : vector<1x128xi32> to vector<1x128xi32>
    %69 = vector.broadcast %68 : vector<1x128xi32> to vector<8x128xi32>
    %70 = vector.broadcast %c128_i32 : i32 to vector<8x128xi32>
    %71 = arith.select %67, %69, %70 : vector<8x128xi1>, vector<8x128xi32>
    %cst_24 = arith.constant dense<2147483647> : vector<8xi32>
    %72 = vector.multi_reduction <minsi>, %71, %cst_24 [1] : vector<8x128xi32> to vector<8xi32>
    %73 = vector.shape_cast %72 : vector<8xi32> to vector<8x1xi32>
    %c0_i32_25 = arith.constant 0 : i32
    %74 = arith.addi %10, %c0_i32_25 : i32
    %75 = vector.broadcast %74 : i32 to vector<8x1xi32>
    %76 = arith.addi %73, %75 : vector<8x1xi32>
    %77 = arith.cmpf ogt, %65, %11 : vector<8x1xf32>
    %78 = arith.select %77, %76, %12 : vector<8x1xi1>, vector<8x1xi32>
    %79 = arith.select %77, %65, %11 : vector<8x1xi1>, vector<8x1xf32>
    %c0_i32_26 = arith.constant 0 : i32
    %c0_i32_27 = arith.constant 0 : i32
    %c0_i32_28 = arith.constant 0 : i32
    %80 = tpu.memref_slice %arg2[%c0_i32_26, %c0_i32_27, %c0_i32_28] : memref<4x4x128xf32, #tpu.memory_space<vmem>> -> memref<1x4x128xf32, #tpu.memory_space<vmem>>
    %81 = tpu.memref_squeeze %80 : memref<1x4x128xf32, #tpu.memory_space<vmem>> -> memref<4x128xf32, #tpu.memory_space<vmem>>
    %c1 = arith.constant 1 : index
    %c0_29 = arith.constant 0 : index
    %82 = vector.load %81[%c1, %c0_29] : memref<4x128xf32, #tpu.memory_space<vmem>>, vector<1x128xf32>
    %c1_i32_30 = arith.constant 1 : i32
    %c0_i32_31 = arith.constant 0 : i32
    %c0_i32_32 = arith.constant 0 : i32
    %83 = tpu.memref_slice %arg2[%c1_i32_30, %c0_i32_31, %c0_i32_32] : memref<4x4x128xf32, #tpu.memory_space<vmem>> -> memref<1x4x128xf32, #tpu.memory_space<vmem>>
    %84 = tpu.memref_squeeze %83 : memref<1x4x128xf32, #tpu.memory_space<vmem>> -> memref<4x128xf32, #tpu.memory_space<vmem>>
    %c1_33 = arith.constant 1 : index
    %c0_34 = arith.constant 0 : index
    %85 = vector.load %84[%c1_33, %c0_34] : memref<4x128xf32, #tpu.memory_space<vmem>>, vector<1x128xf32>
    %c2_i32_35 = arith.constant 2 : i32
    %c0_i32_36 = arith.constant 0 : i32
    %c0_i32_37 = arith.constant 0 : i32
    %86 = tpu.memref_slice %arg2[%c2_i32_35, %c0_i32_36, %c0_i32_37] : memref<4x4x128xf32, #tpu.memory_space<vmem>> -> memref<1x4x128xf32, #tpu.memory_space<vmem>>
    %87 = tpu.memref_squeeze %86 : memref<1x4x128xf32, #tpu.memory_space<vmem>> -> memref<4x128xf32, #tpu.memory_space<vmem>>
    %c1_38 = arith.constant 1 : index
    %c0_39 = arith.constant 0 : index
    %88 = vector.load %87[%c1_38, %c0_39] : memref<4x128xf32, #tpu.memory_space<vmem>>, vector<1x128xf32>
    %c3_i32_40 = arith.constant 3 : i32
    %c0_i32_41 = arith.constant 0 : i32
    %c0_i32_42 = arith.constant 0 : i32
    %89 = tpu.memref_slice %arg2[%c3_i32_40, %c0_i32_41, %c0_i32_42] : memref<4x4x128xf32, #tpu.memory_space<vmem>> -> memref<1x4x128xf32, #tpu.memory_space<vmem>>
    %90 = tpu.memref_squeeze %89 : memref<1x4x128xf32, #tpu.memory_space<vmem>> -> memref<4x128xf32, #tpu.memory_space<vmem>>
    %c1_43 = arith.constant 1 : index
    %c0_44 = arith.constant 0 : index
    %91 = vector.load %90[%c1_43, %c0_44] : memref<4x128xf32, #tpu.memory_space<vmem>>, vector<1x128xf32>
    %92 = vector.broadcast %88 : vector<1x128xf32> to vector<8x128xf32>
    %93 = vector.broadcast %3 : vector<8x1xf32> to vector<8x128xf32>
    %94 = arith.minimumf %92, %93 : vector<8x128xf32>
    %95 = vector.broadcast %82 : vector<1x128xf32> to vector<8x128xf32>
    %96 = vector.broadcast %1 : vector<8x1xf32> to vector<8x128xf32>
    %97 = arith.maximumf %95, %96 : vector<8x128xf32>
    %98 = arith.subf %94, %97 : vector<8x128xf32>
    %cst_45 = arith.constant 0.000000e+00 : f32
    %99 = vector.broadcast %cst_45 : f32 to vector<8x128xf32>
    %100 = arith.maximumf %98, %99 : vector<8x128xf32>
    %101 = vector.broadcast %91 : vector<1x128xf32> to vector<8x128xf32>
    %102 = vector.broadcast %4 : vector<8x1xf32> to vector<8x128xf32>
    %103 = arith.minimumf %101, %102 : vector<8x128xf32>
    %104 = vector.broadcast %85 : vector<1x128xf32> to vector<8x128xf32>
    %105 = vector.broadcast %2 : vector<8x1xf32> to vector<8x128xf32>
    %106 = arith.maximumf %104, %105 : vector<8x128xf32>
    %107 = arith.subf %103, %106 : vector<8x128xf32>
    %cst_46 = arith.constant 0.000000e+00 : f32
    %108 = vector.broadcast %cst_46 : f32 to vector<8x128xf32>
    %109 = arith.maximumf %107, %108 : vector<8x128xf32>
    %110 = arith.mulf %100, %109 : vector<8x128xf32>
    %111 = arith.subf %88, %82 : vector<1x128xf32>
    %112 = arith.subf %91, %85 : vector<1x128xf32>
    %113 = arith.mulf %111, %112 : vector<1x128xf32>
    %114 = vector.broadcast %113 : vector<1x128xf32> to vector<8x128xf32>
    %115 = vector.broadcast %7 : vector<8x1xf32> to vector<8x128xf32>
    %116 = arith.addf %114, %115 : vector<8x128xf32>
    %117 = arith.subf %116, %110 : vector<8x128xf32>
    %cst_47 = arith.constant 9.99999996E-13 : f32
    %118 = vector.broadcast %cst_47 : f32 to vector<8x128xf32>
    %119 = arith.maximumf %117, %118 : vector<8x128xf32>
    %120 = arith.divf %110, %119 : vector<8x128xf32>
    %cst_48 = arith.constant dense<0xFF800000> : vector<128xf32>
    %121 = vector.multi_reduction <maximumf>, %120, %cst_48 [0] : vector<8x128xf32> to vector<128xf32>
    %122 = vector.shape_cast %121 : vector<128xf32> to vector<1x128xf32>
    %123 = vector.broadcast %122 : vector<1x128xf32> to vector<8x128xf32>
    %124 = arith.cmpf oge, %120, %123 : vector<8x128xf32>
    %c8_i32_49 = arith.constant 8 : i32
    %125 = vector.shape_cast %8 : vector<8x1xi32> to vector<8x1xi32>
    %126 = vector.broadcast %125 : vector<8x1xi32> to vector<8x128xi32>
    %127 = vector.broadcast %c8_i32_49 : i32 to vector<8x128xi32>
    %128 = arith.select %124, %126, %127 : vector<8x128xi1>, vector<8x128xi32>
    %cst_50 = arith.constant dense<2147483647> : vector<128xi32>
    %129 = vector.multi_reduction <minsi>, %128, %cst_50 [0] : vector<8x128xi32> to vector<128xi32>
    %130 = vector.shape_cast %129 : vector<128xi32> to vector<1x128xi32>
    %cst_51 = arith.constant dense<0xFF800000> : vector<8xf32>
    %131 = vector.multi_reduction <maximumf>, %120, %cst_51 [1] : vector<8x128xf32> to vector<8xf32>
    %132 = vector.shape_cast %131 : vector<8xf32> to vector<8x1xf32>
    %133 = vector.broadcast %132 : vector<8x1xf32> to vector<8x128xf32>
    %134 = arith.cmpf oge, %120, %133 : vector<8x128xf32>
    %c128_i32_52 = arith.constant 128 : i32
    %135 = vector.shape_cast %9 : vector<1x128xi32> to vector<1x128xi32>
    %136 = vector.broadcast %135 : vector<1x128xi32> to vector<8x128xi32>
    %137 = vector.broadcast %c128_i32_52 : i32 to vector<8x128xi32>
    %138 = arith.select %134, %136, %137 : vector<8x128xi1>, vector<8x128xi32>
    %cst_53 = arith.constant dense<2147483647> : vector<8xi32>
    %139 = vector.multi_reduction <minsi>, %138, %cst_53 [1] : vector<8x128xi32> to vector<8xi32>
    %140 = vector.shape_cast %139 : vector<8xi32> to vector<8x1xi32>
    %c128_i32_54 = arith.constant 128 : i32
    %141 = arith.addi %10, %c128_i32_54 : i32
    %142 = vector.broadcast %141 : i32 to vector<8x1xi32>
    %143 = arith.addi %140, %142 : vector<8x1xi32>
    %144 = arith.cmpf ogt, %132, %79 : vector<8x1xf32>
    %145 = arith.select %144, %143, %78 : vector<8x1xi1>, vector<8x1xi32>
    %146 = arith.select %144, %132, %79 : vector<8x1xi1>, vector<8x1xf32>
    %c0_i32_55 = arith.constant 0 : i32
    %c0_i32_56 = arith.constant 0 : i32
    %c0_i32_57 = arith.constant 0 : i32
    %147 = tpu.memref_slice %arg2[%c0_i32_55, %c0_i32_56, %c0_i32_57] : memref<4x4x128xf32, #tpu.memory_space<vmem>> -> memref<1x4x128xf32, #tpu.memory_space<vmem>>
    %148 = tpu.memref_squeeze %147 : memref<1x4x128xf32, #tpu.memory_space<vmem>> -> memref<4x128xf32, #tpu.memory_space<vmem>>
    %c2 = arith.constant 2 : index
    %c0_58 = arith.constant 0 : index
    %149 = vector.load %148[%c2, %c0_58] : memref<4x128xf32, #tpu.memory_space<vmem>>, vector<1x128xf32>
    %c1_i32_59 = arith.constant 1 : i32
    %c0_i32_60 = arith.constant 0 : i32
    %c0_i32_61 = arith.constant 0 : i32
    %150 = tpu.memref_slice %arg2[%c1_i32_59, %c0_i32_60, %c0_i32_61] : memref<4x4x128xf32, #tpu.memory_space<vmem>> -> memref<1x4x128xf32, #tpu.memory_space<vmem>>
    %151 = tpu.memref_squeeze %150 : memref<1x4x128xf32, #tpu.memory_space<vmem>> -> memref<4x128xf32, #tpu.memory_space<vmem>>
    %c2_62 = arith.constant 2 : index
    %c0_63 = arith.constant 0 : index
    %152 = vector.load %151[%c2_62, %c0_63] : memref<4x128xf32, #tpu.memory_space<vmem>>, vector<1x128xf32>
    %c2_i32_64 = arith.constant 2 : i32
    %c0_i32_65 = arith.constant 0 : i32
    %c0_i32_66 = arith.constant 0 : i32
    %153 = tpu.memref_slice %arg2[%c2_i32_64, %c0_i32_65, %c0_i32_66] : memref<4x4x128xf32, #tpu.memory_space<vmem>> -> memref<1x4x128xf32, #tpu.memory_space<vmem>>
    %154 = tpu.memref_squeeze %153 : memref<1x4x128xf32, #tpu.memory_space<vmem>> -> memref<4x128xf32, #tpu.memory_space<vmem>>
    %c2_67 = arith.constant 2 : index
    %c0_68 = arith.constant 0 : index
    %155 = vector.load %154[%c2_67, %c0_68] : memref<4x128xf32, #tpu.memory_space<vmem>>, vector<1x128xf32>
    %c3_i32_69 = arith.constant 3 : i32
    %c0_i32_70 = arith.constant 0 : i32
    %c0_i32_71 = arith.constant 0 : i32
    %156 = tpu.memref_slice %arg2[%c3_i32_69, %c0_i32_70, %c0_i32_71] : memref<4x4x128xf32, #tpu.memory_space<vmem>> -> memref<1x4x128xf32, #tpu.memory_space<vmem>>
    %157 = tpu.memref_squeeze %156 : memref<1x4x128xf32, #tpu.memory_space<vmem>> -> memref<4x128xf32, #tpu.memory_space<vmem>>
    %c2_72 = arith.constant 2 : index
    %c0_73 = arith.constant 0 : index
    %158 = vector.load %157[%c2_72, %c0_73] : memref<4x128xf32, #tpu.memory_space<vmem>>, vector<1x128xf32>
    %159 = vector.broadcast %155 : vector<1x128xf32> to vector<8x128xf32>
    %160 = vector.broadcast %3 : vector<8x1xf32> to vector<8x128xf32>
    %161 = arith.minimumf %159, %160 : vector<8x128xf32>
    %162 = vector.broadcast %149 : vector<1x128xf32> to vector<8x128xf32>
    %163 = vector.broadcast %1 : vector<8x1xf32> to vector<8x128xf32>
    %164 = arith.maximumf %162, %163 : vector<8x128xf32>
    %165 = arith.subf %161, %164 : vector<8x128xf32>
    %cst_74 = arith.constant 0.000000e+00 : f32
    %166 = vector.broadcast %cst_74 : f32 to vector<8x128xf32>
    %167 = arith.maximumf %165, %166 : vector<8x128xf32>
    %168 = vector.broadcast %158 : vector<1x128xf32> to vector<8x128xf32>
    %169 = vector.broadcast %4 : vector<8x1xf32> to vector<8x128xf32>
    %170 = arith.minimumf %168, %169 : vector<8x128xf32>
    %171 = vector.broadcast %152 : vector<1x128xf32> to vector<8x128xf32>
    %172 = vector.broadcast %2 : vector<8x1xf32> to vector<8x128xf32>
    %173 = arith.maximumf %171, %172 : vector<8x128xf32>
    %174 = arith.subf %170, %173 : vector<8x128xf32>
    %cst_75 = arith.constant 0.000000e+00 : f32
    %175 = vector.broadcast %cst_75 : f32 to vector<8x128xf32>
    %176 = arith.maximumf %174, %175 : vector<8x128xf32>
    %177 = arith.mulf %167, %176 : vector<8x128xf32>
    %178 = arith.subf %155, %149 : vector<1x128xf32>
    %179 = arith.subf %158, %152 : vector<1x128xf32>
    %180 = arith.mulf %178, %179 : vector<1x128xf32>
    %181 = vector.broadcast %180 : vector<1x128xf32> to vector<8x128xf32>
    %182 = vector.broadcast %7 : vector<8x1xf32> to vector<8x128xf32>
    %183 = arith.addf %181, %182 : vector<8x128xf32>
    %184 = arith.subf %183, %177 : vector<8x128xf32>
    %cst_76 = arith.constant 9.99999996E-13 : f32
    %185 = vector.broadcast %cst_76 : f32 to vector<8x128xf32>
    %186 = arith.maximumf %184, %185 : vector<8x128xf32>
    %187 = arith.divf %177, %186 : vector<8x128xf32>
    %cst_77 = arith.constant dense<0xFF800000> : vector<128xf32>
    %188 = vector.multi_reduction <maximumf>, %187, %cst_77 [0] : vector<8x128xf32> to vector<128xf32>
    %189 = vector.shape_cast %188 : vector<128xf32> to vector<1x128xf32>
    %190 = vector.broadcast %189 : vector<1x128xf32> to vector<8x128xf32>
    %191 = arith.cmpf oge, %187, %190 : vector<8x128xf32>
    %c8_i32_78 = arith.constant 8 : i32
    %192 = vector.shape_cast %8 : vector<8x1xi32> to vector<8x1xi32>
    %193 = vector.broadcast %192 : vector<8x1xi32> to vector<8x128xi32>
    %194 = vector.broadcast %c8_i32_78 : i32 to vector<8x128xi32>
    %195 = arith.select %191, %193, %194 : vector<8x128xi1>, vector<8x128xi32>
    %cst_79 = arith.constant dense<2147483647> : vector<128xi32>
    %196 = vector.multi_reduction <minsi>, %195, %cst_79 [0] : vector<8x128xi32> to vector<128xi32>
    %197 = vector.shape_cast %196 : vector<128xi32> to vector<1x128xi32>
    %cst_80 = arith.constant dense<0xFF800000> : vector<8xf32>
    %198 = vector.multi_reduction <maximumf>, %187, %cst_80 [1] : vector<8x128xf32> to vector<8xf32>
    %199 = vector.shape_cast %198 : vector<8xf32> to vector<8x1xf32>
    %200 = vector.broadcast %199 : vector<8x1xf32> to vector<8x128xf32>
    %201 = arith.cmpf oge, %187, %200 : vector<8x128xf32>
    %c128_i32_81 = arith.constant 128 : i32
    %202 = vector.shape_cast %9 : vector<1x128xi32> to vector<1x128xi32>
    %203 = vector.broadcast %202 : vector<1x128xi32> to vector<8x128xi32>
    %204 = vector.broadcast %c128_i32_81 : i32 to vector<8x128xi32>
    %205 = arith.select %201, %203, %204 : vector<8x128xi1>, vector<8x128xi32>
    %cst_82 = arith.constant dense<2147483647> : vector<8xi32>
    %206 = vector.multi_reduction <minsi>, %205, %cst_82 [1] : vector<8x128xi32> to vector<8xi32>
    %207 = vector.shape_cast %206 : vector<8xi32> to vector<8x1xi32>
    %c256_i32 = arith.constant 256 : i32
    %208 = arith.addi %10, %c256_i32 : i32
    %209 = vector.broadcast %208 : i32 to vector<8x1xi32>
    %210 = arith.addi %207, %209 : vector<8x1xi32>
    %211 = arith.cmpf ogt, %199, %146 : vector<8x1xf32>
    %212 = arith.select %211, %210, %145 : vector<8x1xi1>, vector<8x1xi32>
    %213 = arith.select %211, %199, %146 : vector<8x1xi1>, vector<8x1xf32>
    %c0_i32_83 = arith.constant 0 : i32
    %c0_i32_84 = arith.constant 0 : i32
    %c0_i32_85 = arith.constant 0 : i32
    %214 = tpu.memref_slice %arg2[%c0_i32_83, %c0_i32_84, %c0_i32_85] : memref<4x4x128xf32, #tpu.memory_space<vmem>> -> memref<1x4x128xf32, #tpu.memory_space<vmem>>
    %215 = tpu.memref_squeeze %214 : memref<1x4x128xf32, #tpu.memory_space<vmem>> -> memref<4x128xf32, #tpu.memory_space<vmem>>
    %c3 = arith.constant 3 : index
    %c0_86 = arith.constant 0 : index
    %216 = vector.load %215[%c3, %c0_86] : memref<4x128xf32, #tpu.memory_space<vmem>>, vector<1x128xf32>
    %c1_i32_87 = arith.constant 1 : i32
    %c0_i32_88 = arith.constant 0 : i32
    %c0_i32_89 = arith.constant 0 : i32
    %217 = tpu.memref_slice %arg2[%c1_i32_87, %c0_i32_88, %c0_i32_89] : memref<4x4x128xf32, #tpu.memory_space<vmem>> -> memref<1x4x128xf32, #tpu.memory_space<vmem>>
    %218 = tpu.memref_squeeze %217 : memref<1x4x128xf32, #tpu.memory_space<vmem>> -> memref<4x128xf32, #tpu.memory_space<vmem>>
    %c3_90 = arith.constant 3 : index
    %c0_91 = arith.constant 0 : index
    %219 = vector.load %218[%c3_90, %c0_91] : memref<4x128xf32, #tpu.memory_space<vmem>>, vector<1x128xf32>
    %c2_i32_92 = arith.constant 2 : i32
    %c0_i32_93 = arith.constant 0 : i32
    %c0_i32_94 = arith.constant 0 : i32
    %220 = tpu.memref_slice %arg2[%c2_i32_92, %c0_i32_93, %c0_i32_94] : memref<4x4x128xf32, #tpu.memory_space<vmem>> -> memref<1x4x128xf32, #tpu.memory_space<vmem>>
    %221 = tpu.memref_squeeze %220 : memref<1x4x128xf32, #tpu.memory_space<vmem>> -> memref<4x128xf32, #tpu.memory_space<vmem>>
    %c3_95 = arith.constant 3 : index
    %c0_96 = arith.constant 0 : index
    %222 = vector.load %221[%c3_95, %c0_96] : memref<4x128xf32, #tpu.memory_space<vmem>>, vector<1x128xf32>
    %c3_i32_97 = arith.constant 3 : i32
    %c0_i32_98 = arith.constant 0 : i32
    %c0_i32_99 = arith.constant 0 : i32
    %223 = tpu.memref_slice %arg2[%c3_i32_97, %c0_i32_98, %c0_i32_99] : memref<4x4x128xf32, #tpu.memory_space<vmem>> -> memref<1x4x128xf32, #tpu.memory_space<vmem>>
    %224 = tpu.memref_squeeze %223 : memref<1x4x128xf32, #tpu.memory_space<vmem>> -> memref<4x128xf32, #tpu.memory_space<vmem>>
    %c3_100 = arith.constant 3 : index
    %c0_101 = arith.constant 0 : index
    %225 = vector.load %224[%c3_100, %c0_101] : memref<4x128xf32, #tpu.memory_space<vmem>>, vector<1x128xf32>
    %226 = vector.broadcast %222 : vector<1x128xf32> to vector<8x128xf32>
    %227 = vector.broadcast %3 : vector<8x1xf32> to vector<8x128xf32>
    %228 = arith.minimumf %226, %227 : vector<8x128xf32>
    %229 = vector.broadcast %216 : vector<1x128xf32> to vector<8x128xf32>
    %230 = vector.broadcast %1 : vector<8x1xf32> to vector<8x128xf32>
    %231 = arith.maximumf %229, %230 : vector<8x128xf32>
    %232 = arith.subf %228, %231 : vector<8x128xf32>
    %cst_102 = arith.constant 0.000000e+00 : f32
    %233 = vector.broadcast %cst_102 : f32 to vector<8x128xf32>
    %234 = arith.maximumf %232, %233 : vector<8x128xf32>
    %235 = vector.broadcast %225 : vector<1x128xf32> to vector<8x128xf32>
    %236 = vector.broadcast %4 : vector<8x1xf32> to vector<8x128xf32>
    %237 = arith.minimumf %235, %236 : vector<8x128xf32>
    %238 = vector.broadcast %219 : vector<1x128xf32> to vector<8x128xf32>
    %239 = vector.broadcast %2 : vector<8x1xf32> to vector<8x128xf32>
    %240 = arith.maximumf %238, %239 : vector<8x128xf32>
    %241 = arith.subf %237, %240 : vector<8x128xf32>
    %cst_103 = arith.constant 0.000000e+00 : f32
    %242 = vector.broadcast %cst_103 : f32 to vector<8x128xf32>
    %243 = arith.maximumf %241, %242 : vector<8x128xf32>
    %244 = arith.mulf %234, %243 : vector<8x128xf32>
    %245 = arith.subf %222, %216 : vector<1x128xf32>
    %246 = arith.subf %225, %219 : vector<1x128xf32>
    %247 = arith.mulf %245, %246 : vector<1x128xf32>
    %248 = vector.broadcast %247 : vector<1x128xf32> to vector<8x128xf32>
    %249 = vector.broadcast %7 : vector<8x1xf32> to vector<8x128xf32>
    %250 = arith.addf %248, %249 : vector<8x128xf32>
    %251 = arith.subf %250, %244 : vector<8x128xf32>
    %cst_104 = arith.constant 9.99999996E-13 : f32
    %252 = vector.broadcast %cst_104 : f32 to vector<8x128xf32>
    %253 = arith.maximumf %251, %252 : vector<8x128xf32>
    %254 = arith.divf %244, %253 : vector<8x128xf32>
    %cst_105 = arith.constant dense<0xFF800000> : vector<128xf32>
    %255 = vector.multi_reduction <maximumf>, %254, %cst_105 [0] : vector<8x128xf32> to vector<128xf32>
    %256 = vector.shape_cast %255 : vector<128xf32> to vector<1x128xf32>
    %257 = vector.broadcast %256 : vector<1x128xf32> to vector<8x128xf32>
    %258 = arith.cmpf oge, %254, %257 : vector<8x128xf32>
    %c8_i32_106 = arith.constant 8 : i32
    %259 = vector.shape_cast %8 : vector<8x1xi32> to vector<8x1xi32>
    %260 = vector.broadcast %259 : vector<8x1xi32> to vector<8x128xi32>
    %261 = vector.broadcast %c8_i32_106 : i32 to vector<8x128xi32>
    %262 = arith.select %258, %260, %261 : vector<8x128xi1>, vector<8x128xi32>
    %cst_107 = arith.constant dense<2147483647> : vector<128xi32>
    %263 = vector.multi_reduction <minsi>, %262, %cst_107 [0] : vector<8x128xi32> to vector<128xi32>
    %264 = vector.shape_cast %263 : vector<128xi32> to vector<1x128xi32>
    %cst_108 = arith.constant dense<0xFF800000> : vector<8xf32>
    %265 = vector.multi_reduction <maximumf>, %254, %cst_108 [1] : vector<8x128xf32> to vector<8xf32>
    %266 = vector.shape_cast %265 : vector<8xf32> to vector<8x1xf32>
    %267 = vector.broadcast %266 : vector<8x1xf32> to vector<8x128xf32>
    %268 = arith.cmpf oge, %254, %267 : vector<8x128xf32>
    %c128_i32_109 = arith.constant 128 : i32
    %269 = vector.shape_cast %9 : vector<1x128xi32> to vector<1x128xi32>
    %270 = vector.broadcast %269 : vector<1x128xi32> to vector<8x128xi32>
    %271 = vector.broadcast %c128_i32_109 : i32 to vector<8x128xi32>
    %272 = arith.select %268, %270, %271 : vector<8x128xi1>, vector<8x128xi32>
    %cst_110 = arith.constant dense<2147483647> : vector<8xi32>
    %273 = vector.multi_reduction <minsi>, %272, %cst_110 [1] : vector<8x128xi32> to vector<8xi32>
    %274 = vector.shape_cast %273 : vector<8xi32> to vector<8x1xi32>
    %c384_i32 = arith.constant 384 : i32
    %275 = arith.addi %10, %c384_i32 : i32
    %276 = vector.broadcast %275 : i32 to vector<8x1xi32>
    %277 = arith.addi %274, %276 : vector<8x1xi32>
    %278 = arith.cmpf ogt, %266, %213 : vector<8x1xf32>
    %279 = arith.select %278, %277, %212 : vector<8x1xi1>, vector<8x1xi32>
    %280 = arith.select %278, %266, %213 : vector<8x1xi1>, vector<8x1xf32>
    %281 = tpu.concatenate %55, %122, %189, %256 in 0 : vector<1x128xf32>, vector<1x128xf32>, vector<1x128xf32>, vector<1x128xf32> -> vector<4x128xf32>
    %c0_111 = arith.constant 0 : index
    %c0_112 = arith.constant 0 : index
    %282 = vector.load %arg3[%c0_111, %c0_112] : memref<4x128xf32, #tpu.memory_space<vmem>>, vector<4x128xf32>
    tpu.vector_store %arg3[%c0_111, %c0_112], %281 {strides = array<i32>} : memref<4x128xf32, #tpu.memory_space<vmem>>, vector<4x128xf32>,
    %283 = tpu.concatenate %63, %130, %197, %264 in 0 : vector<1x128xi32>, vector<1x128xi32>, vector<1x128xi32>, vector<1x128xi32> -> vector<4x128xi32>
    %c0_113 = arith.constant 0 : index
    %c0_114 = arith.constant 0 : index
    %284 = vector.load %arg4[%c0_113, %c0_114] : memref<4x128xi32, #tpu.memory_space<vmem>>, vector<4x128xi32>
    tpu.vector_store %arg4[%c0_113, %c0_114], %283 {strides = array<i32>} : memref<4x128xi32, #tpu.memory_space<vmem>>, vector<4x128xi32>,
    %285 = vector.shape_cast %280 : vector<8x1xf32> to vector<8x1xf32>
    %286 = vector.broadcast %285 : vector<8x1xf32> to vector<8x128xf32>
    %c0_115 = arith.constant 0 : index
    %c0_116 = arith.constant 0 : index
    %287 = vector.load %arg5[%c0_115, %c0_116] : memref<8x128xf32, #tpu.memory_space<vmem>>, vector<8x128xf32>
    tpu.vector_store %arg5[%c0_115, %c0_116], %286 {strides = array<i32>} : memref<8x128xf32, #tpu.memory_space<vmem>>, vector<8x128xf32>,
    %288 = vector.shape_cast %279 : vector<8x1xi32> to vector<8x1xi32>
    %289 = vector.broadcast %288 : vector<8x1xi32> to vector<8x128xi32>
    %c0_117 = arith.constant 0 : index
    %c0_118 = arith.constant 0 : index
    %290 = vector.load %arg6[%c0_117, %c0_118] : memref<8x128xi32, #tpu.memory_space<vmem>>, vector<8x128xi32>
    tpu.vector_store %arg6[%c0_117, %c0_118], %289 {strides = array<i32>} : memref<8x128xi32, #tpu.memory_space<vmem>>, vector<8x128xi32>,
    return
  }
  func.func @transform_0(%arg0: i32) -> (i32, i32) {
    %c0_i32 = arith.constant 0 : i32
    %c0_i32_0 = arith.constant 0 : i32
    %c0_i32_1 = arith.constant 0 : i32
    return %c0_i32, %c0_i32_0 : i32, i32
  }
  func.func @transform_1(%arg0: i32) -> (i32, i32, i32) {
    %c0_i32 = arith.constant 0 : i32
    %c0_i32_0 = arith.constant 0 : i32
    %c0_i32_1 = arith.constant 0 : i32
    return %c0_i32, %arg0, %c0_i32_0 : i32, i32, i32
  }
  func.func @transform_2(%arg0: i32) -> (i32, i32) {
    %c0_i32 = arith.constant 0 : i32
    %c0_i32_0 = arith.constant 0 : i32
    return %arg0, %c0_i32 : i32, i32
  }
  func.func @transform_3(%arg0: i32) -> (i32, i32) {
    %c0_i32 = arith.constant 0 : i32
    %c0_i32_0 = arith.constant 0 : i32
    return %arg0, %c0_i32 : i32, i32
  }
  func.func @transform_4(%arg0: i32) -> (i32, i32) {
    %c0_i32 = arith.constant 0 : i32
    %c0_i32_0 = arith.constant 0 : i32
    return %c0_i32, %arg0 : i32, i32
  }
  func.func @transform_5(%arg0: i32) -> (i32, i32) {
    %c0_i32 = arith.constant 0 : i32
    %c0_i32_0 = arith.constant 0 : i32
    return %c0_i32, %arg0 : i32, i32
  }
}

module attributes {stable_mosaic.version = 11 : i64} {
  func.func @loss_kernel(%arg0: i32, %arg1: memref<8x4xf32, #tpu.memory_space<smem>>, %arg2: memref<2x4x128xf32, #tpu.memory_space<vmem>>, %arg3: memref<4x4x128xf32, #tpu.memory_space<vmem>>, %arg4: memref<4x4x128xf32, #tpu.memory_space<vmem>>, %arg5: memref<4x128xi32, #tpu.memory_space<vmem>>, %arg6: memref<4x128xf32, #tpu.memory_space<vmem>>, %arg7: memref<8x128xf32, #tpu.memory_space<vmem>>) attributes {dimension_semantics = [#tpu.dimension_semantics<parallel>], iteration_bounds = array<i64: 1>, scalar_prefetch = 0 : i64, scratch_operands = 0 : i64, tpu.core_type = #tpu.core_type<tc>, window_params = [{transform_indices = @transform_0, window_bounds = array<i64: 8, 4>}, {transform_indices = @transform_1, window_bounds = array<i64: 2, 4, 128>}, {transform_indices = @transform_2, window_bounds = array<i64: 4, 4, 128>}, {transform_indices = @transform_3, window_bounds = array<i64: 4, 4, 128>}, {transform_indices = @transform_4, window_bounds = array<i64: 4, 128>}, {transform_indices = @transform_5, window_bounds = array<i64: 4, 128>}, {transform_indices = @transform_6, window_bounds = array<i64: 8, 128>}]} {
    %cst = arith.constant 0.000000e+00 : f32
    %0 = vector.broadcast %cst : f32 to vector<1x1xf32>
    %cst_0 = arith.constant 0.000000e+00 : f32
    %1 = vector.broadcast %cst_0 : f32 to vector<1x1xf32>
    %cst_1 = arith.constant 0.000000e+00 : f32
    %2 = vector.broadcast %cst_1 : f32 to vector<1x1xf32>
    %c0 = arith.constant 0 : index
    %c0_2 = arith.constant 0 : index
    %3 = vector.load %arg6[%c0, %c0_2] : memref<4x128xf32, #tpu.memory_space<vmem>>, vector<4x128xf32>
    %cst_3 = arith.constant 0.000000e+00 : f32
    %4 = vector.broadcast %cst_3 : f32 to vector<4x128xf32>
    %5 = arith.maximumf %3, %4 : vector<4x128xf32>
    %cst_4 = arith.constant 0.000000e+00 : f32
    %6 = vector.broadcast %cst_4 : f32 to vector<4x128xf32>
    %7 = arith.subf %6, %3 : vector<4x128xf32>
    %cst_5 = arith.constant 0.000000e+00 : f32
    %8 = vector.broadcast %cst_5 : f32 to vector<4x128xf32>
    %9 = arith.maximumf %7, %8 : vector<4x128xf32>
    %c1_i32 = arith.constant 1 : i32
    %c0_i32 = arith.constant 0 : i32
    %c0_i32_6 = arith.constant 0 : i32
    %10 = tpu.memref_slice %arg2[%c1_i32, %c0_i32, %c0_i32_6] : memref<2x4x128xf32, #tpu.memory_space<vmem>> -> memref<1x4x128xf32, #tpu.memory_space<vmem>>
    %11 = tpu.memref_squeeze %10 : memref<1x4x128xf32, #tpu.memory_space<vmem>> -> memref<4x128xf32, #tpu.memory_space<vmem>>
    %c0_7 = arith.constant 0 : index
    %c0_8 = arith.constant 0 : index
    %12 = vector.load %11[%c0_7, %c0_8] : memref<4x128xf32, #tpu.memory_space<vmem>>, vector<4x128xf32>
    %c0_i32_9 = arith.constant 0 : i32
    %c0_i32_10 = arith.constant 0 : i32
    %c0_i32_11 = arith.constant 0 : i32
    %13 = tpu.memref_slice %arg2[%c0_i32_9, %c0_i32_10, %c0_i32_11] : memref<2x4x128xf32, #tpu.memory_space<vmem>> -> memref<1x4x128xf32, #tpu.memory_space<vmem>>
    %14 = tpu.memref_squeeze %13 : memref<1x4x128xf32, #tpu.memory_space<vmem>> -> memref<4x128xf32, #tpu.memory_space<vmem>>
    %c0_12 = arith.constant 0 : index
    %c0_13 = arith.constant 0 : index
    %15 = vector.load %14[%c0_12, %c0_13] : memref<4x128xf32, #tpu.memory_space<vmem>>, vector<4x128xf32>
    %16 = arith.subf %12, %15 : vector<4x128xf32>
    %17 = math.absf %16 : vector<4x128xf32>
    %cst_14 = arith.constant 0.000000e+00 : f32
    %18 = vector.broadcast %cst_14 : f32 to vector<4x128xf32>
    %19 = arith.subf %18, %17 : vector<4x128xf32>
    %20 = math.exp %19 : vector<4x128xf32>
    %cst_15 = arith.constant 1.000000e+00 : f32
    %21 = vector.broadcast %cst_15 : f32 to vector<4x128xf32>
    %22 = arith.addf %21, %20 : vector<4x128xf32>
    %23 = math.log %22 : vector<4x128xf32>
    %cst_16 = arith.constant 0.000000e+00 : f32
    %24 = vector.broadcast %cst_16 : f32 to vector<4x128xf32>
    %25 = arith.maximumf %16, %24 : vector<4x128xf32>
    %26 = arith.addf %25, %23 : vector<4x128xf32>
    %27 = arith.mulf %5, %26 : vector<4x128xf32>
    %28 = vector.shape_cast %27 : vector<4x128xf32> to vector<1x4x128xf32>
    %cst_17 = arith.constant dense<0.000000e+00> : vector<1xf32>
    %29 = vector.multi_reduction <add>, %28, %cst_17 [1, 2] : vector<1x4x128xf32> to vector<1xf32>
    %30 = vector.shape_cast %29 : vector<1xf32> to vector<1x1x1xf32>
    %31 = vector.extract %30[0, 0, 0] : f32 from vector<1x1x1xf32>
    %32 = vector.broadcast %31 : f32 to vector<1x1xf32>
    %33 = arith.addf %0, %32 : vector<1x1xf32>
    %cst_18 = arith.constant 0.000000e+00 : f32
    %34 = vector.broadcast %cst_18 : f32 to vector<4x128xf32>
    %35 = arith.subf %34, %16 : vector<4x128xf32>
    %cst_19 = arith.constant 0.000000e+00 : f32
    %36 = vector.broadcast %cst_19 : f32 to vector<4x128xf32>
    %37 = arith.maximumf %35, %36 : vector<4x128xf32>
    %38 = arith.addf %37, %23 : vector<4x128xf32>
    %39 = arith.mulf %9, %38 : vector<4x128xf32>
    %40 = vector.shape_cast %39 : vector<4x128xf32> to vector<1x4x128xf32>
    %cst_20 = arith.constant dense<0.000000e+00> : vector<1xf32>
    %41 = vector.multi_reduction <add>, %40, %cst_20 [1, 2] : vector<1x4x128xf32> to vector<1xf32>
    %42 = vector.shape_cast %41 : vector<1xf32> to vector<1x1x1xf32>
    %43 = vector.extract %42[0, 0, 0] : f32 from vector<1x1x1xf32>
    %44 = vector.broadcast %43 : f32 to vector<1x1xf32>
    %45 = arith.addf %1, %44 : vector<1x1xf32>
    %c0_21 = arith.constant 0 : index
    %c0_22 = arith.constant 0 : index
    %46 = vector.load %arg5[%c0_21, %c0_22] : memref<4x128xi32, #tpu.memory_space<vmem>>, vector<4x128xi32>
    %cst_23 = arith.constant 0.000000e+00 : f32
    %47 = vector.broadcast %cst_23 : f32 to vector<4x128xf32>
    %cst_24 = arith.constant 0.000000e+00 : f32
    %48 = vector.broadcast %cst_24 : f32 to vector<4x128xf32>
    %cst_25 = arith.constant 0.000000e+00 : f32
    %49 = vector.broadcast %cst_25 : f32 to vector<4x128xf32>
    %cst_26 = arith.constant 0.000000e+00 : f32
    %50 = vector.broadcast %cst_26 : f32 to vector<4x128xf32>
    %c0_i32_27 = arith.constant 0 : i32
    %51 = vector.broadcast %c0_i32_27 : i32 to vector<4x128xi32>
    %52 = arith.cmpi eq, %46, %51 : vector<4x128xi32>
    %53 = arith.extui %52 : vector<4x128xi1> to vector<4x128xi32>
    %54 = arith.sitofp %53 : vector<4x128xi32> to vector<4x128xf32>
    %c0_28 = arith.constant 0 : index
    %c0_29 = arith.constant 0 : index
    %55 = memref.load %arg1[%c0_28, %c0_29] : memref<8x4xf32, #tpu.memory_space<smem>>
    %56 = vector.broadcast %55 : f32 to vector<4x128xf32>
    %57 = arith.mulf %54, %56 : vector<4x128xf32>
    %58 = arith.addf %47, %57 : vector<4x128xf32>
    %c0_30 = arith.constant 0 : index
    %c1 = arith.constant 1 : index
    %59 = memref.load %arg1[%c0_30, %c1] : memref<8x4xf32, #tpu.memory_space<smem>>
    %60 = vector.broadcast %59 : f32 to vector<4x128xf32>
    %61 = arith.mulf %54, %60 : vector<4x128xf32>
    %62 = arith.addf %48, %61 : vector<4x128xf32>
    %c0_31 = arith.constant 0 : index
    %c2 = arith.constant 2 : index
    %63 = memref.load %arg1[%c0_31, %c2] : memref<8x4xf32, #tpu.memory_space<smem>>
    %64 = vector.broadcast %63 : f32 to vector<4x128xf32>
    %65 = arith.mulf %54, %64 : vector<4x128xf32>
    %66 = arith.addf %49, %65 : vector<4x128xf32>
    %c0_32 = arith.constant 0 : index
    %c3 = arith.constant 3 : index
    %67 = memref.load %arg1[%c0_32, %c3] : memref<8x4xf32, #tpu.memory_space<smem>>
    %68 = vector.broadcast %67 : f32 to vector<4x128xf32>
    %69 = arith.mulf %54, %68 : vector<4x128xf32>
    %70 = arith.addf %50, %69 : vector<4x128xf32>
    %c1_i32_33 = arith.constant 1 : i32
    %71 = vector.broadcast %c1_i32_33 : i32 to vector<4x128xi32>
    %72 = arith.cmpi eq, %46, %71 : vector<4x128xi32>
    %73 = arith.extui %72 : vector<4x128xi1> to vector<4x128xi32>
    %74 = arith.sitofp %73 : vector<4x128xi32> to vector<4x128xf32>
    %c1_34 = arith.constant 1 : index
    %c0_35 = arith.constant 0 : index
    %75 = memref.load %arg1[%c1_34, %c0_35] : memref<8x4xf32, #tpu.memory_space<smem>>
    %76 = vector.broadcast %75 : f32 to vector<4x128xf32>
    %77 = arith.mulf %74, %76 : vector<4x128xf32>
    %78 = arith.addf %58, %77 : vector<4x128xf32>
    %c1_36 = arith.constant 1 : index
    %c1_37 = arith.constant 1 : index
    %79 = memref.load %arg1[%c1_36, %c1_37] : memref<8x4xf32, #tpu.memory_space<smem>>
    %80 = vector.broadcast %79 : f32 to vector<4x128xf32>
    %81 = arith.mulf %74, %80 : vector<4x128xf32>
    %82 = arith.addf %62, %81 : vector<4x128xf32>
    %c1_38 = arith.constant 1 : index
    %c2_39 = arith.constant 2 : index
    %83 = memref.load %arg1[%c1_38, %c2_39] : memref<8x4xf32, #tpu.memory_space<smem>>
    %84 = vector.broadcast %83 : f32 to vector<4x128xf32>
    %85 = arith.mulf %74, %84 : vector<4x128xf32>
    %86 = arith.addf %66, %85 : vector<4x128xf32>
    %c1_40 = arith.constant 1 : index
    %c3_41 = arith.constant 3 : index
    %87 = memref.load %arg1[%c1_40, %c3_41] : memref<8x4xf32, #tpu.memory_space<smem>>
    %88 = vector.broadcast %87 : f32 to vector<4x128xf32>
    %89 = arith.mulf %74, %88 : vector<4x128xf32>
    %90 = arith.addf %70, %89 : vector<4x128xf32>
    %c2_i32 = arith.constant 2 : i32
    %91 = vector.broadcast %c2_i32 : i32 to vector<4x128xi32>
    %92 = arith.cmpi eq, %46, %91 : vector<4x128xi32>
    %93 = arith.extui %92 : vector<4x128xi1> to vector<4x128xi32>
    %94 = arith.sitofp %93 : vector<4x128xi32> to vector<4x128xf32>
    %c2_42 = arith.constant 2 : index
    %c0_43 = arith.constant 0 : index
    %95 = memref.load %arg1[%c2_42, %c0_43] : memref<8x4xf32, #tpu.memory_space<smem>>
    %96 = vector.broadcast %95 : f32 to vector<4x128xf32>
    %97 = arith.mulf %94, %96 : vector<4x128xf32>
    %98 = arith.addf %78, %97 : vector<4x128xf32>
    %c2_44 = arith.constant 2 : index
    %c1_45 = arith.constant 1 : index
    %99 = memref.load %arg1[%c2_44, %c1_45] : memref<8x4xf32, #tpu.memory_space<smem>>
    %100 = vector.broadcast %99 : f32 to vector<4x128xf32>
    %101 = arith.mulf %94, %100 : vector<4x128xf32>
    %102 = arith.addf %82, %101 : vector<4x128xf32>
    %c2_46 = arith.constant 2 : index
    %c2_47 = arith.constant 2 : index
    %103 = memref.load %arg1[%c2_46, %c2_47] : memref<8x4xf32, #tpu.memory_space<smem>>
    %104 = vector.broadcast %103 : f32 to vector<4x128xf32>
    %105 = arith.mulf %94, %104 : vector<4x128xf32>
    %106 = arith.addf %86, %105 : vector<4x128xf32>
    %c2_48 = arith.constant 2 : index
    %c3_49 = arith.constant 3 : index
    %107 = memref.load %arg1[%c2_48, %c3_49] : memref<8x4xf32, #tpu.memory_space<smem>>
    %108 = vector.broadcast %107 : f32 to vector<4x128xf32>
    %109 = arith.mulf %94, %108 : vector<4x128xf32>
    %110 = arith.addf %90, %109 : vector<4x128xf32>
    %c3_i32 = arith.constant 3 : i32
    %111 = vector.broadcast %c3_i32 : i32 to vector<4x128xi32>
    %112 = arith.cmpi eq, %46, %111 : vector<4x128xi32>
    %113 = arith.extui %112 : vector<4x128xi1> to vector<4x128xi32>
    %114 = arith.sitofp %113 : vector<4x128xi32> to vector<4x128xf32>
    %c3_50 = arith.constant 3 : index
    %c0_51 = arith.constant 0 : index
    %115 = memref.load %arg1[%c3_50, %c0_51] : memref<8x4xf32, #tpu.memory_space<smem>>
    %116 = vector.broadcast %115 : f32 to vector<4x128xf32>
    %117 = arith.mulf %114, %116 : vector<4x128xf32>
    %118 = arith.addf %98, %117 : vector<4x128xf32>
    %c3_52 = arith.constant 3 : index
    %c1_53 = arith.constant 1 : index
    %119 = memref.load %arg1[%c3_52, %c1_53] : memref<8x4xf32, #tpu.memory_space<smem>>
    %120 = vector.broadcast %119 : f32 to vector<4x128xf32>
    %121 = arith.mulf %114, %120 : vector<4x128xf32>
    %122 = arith.addf %102, %121 : vector<4x128xf32>
    %c3_54 = arith.constant 3 : index
    %c2_55 = arith.constant 2 : index
    %123 = memref.load %arg1[%c3_54, %c2_55] : memref<8x4xf32, #tpu.memory_space<smem>>
    %124 = vector.broadcast %123 : f32 to vector<4x128xf32>
    %125 = arith.mulf %114, %124 : vector<4x128xf32>
    %126 = arith.addf %106, %125 : vector<4x128xf32>
    %c3_56 = arith.constant 3 : index
    %c3_57 = arith.constant 3 : index
    %127 = memref.load %arg1[%c3_56, %c3_57] : memref<8x4xf32, #tpu.memory_space<smem>>
    %128 = vector.broadcast %127 : f32 to vector<4x128xf32>
    %129 = arith.mulf %114, %128 : vector<4x128xf32>
    %130 = arith.addf %110, %129 : vector<4x128xf32>
    %c4_i32 = arith.constant 4 : i32
    %131 = vector.broadcast %c4_i32 : i32 to vector<4x128xi32>
    %132 = arith.cmpi eq, %46, %131 : vector<4x128xi32>
    %133 = arith.extui %132 : vector<4x128xi1> to vector<4x128xi32>
    %134 = arith.sitofp %133 : vector<4x128xi32> to vector<4x128xf32>
    %c4 = arith.constant 4 : index
    %c0_58 = arith.constant 0 : index
    %135 = memref.load %arg1[%c4, %c0_58] : memref<8x4xf32, #tpu.memory_space<smem>>
    %136 = vector.broadcast %135 : f32 to vector<4x128xf32>
    %137 = arith.mulf %134, %136 : vector<4x128xf32>
    %138 = arith.addf %118, %137 : vector<4x128xf32>
    %c4_59 = arith.constant 4 : index
    %c1_60 = arith.constant 1 : index
    %139 = memref.load %arg1[%c4_59, %c1_60] : memref<8x4xf32, #tpu.memory_space<smem>>
    %140 = vector.broadcast %139 : f32 to vector<4x128xf32>
    %141 = arith.mulf %134, %140 : vector<4x128xf32>
    %142 = arith.addf %122, %141 : vector<4x128xf32>
    %c4_61 = arith.constant 4 : index
    %c2_62 = arith.constant 2 : index
    %143 = memref.load %arg1[%c4_61, %c2_62] : memref<8x4xf32, #tpu.memory_space<smem>>
    %144 = vector.broadcast %143 : f32 to vector<4x128xf32>
    %145 = arith.mulf %134, %144 : vector<4x128xf32>
    %146 = arith.addf %126, %145 : vector<4x128xf32>
    %c4_63 = arith.constant 4 : index
    %c3_64 = arith.constant 3 : index
    %147 = memref.load %arg1[%c4_63, %c3_64] : memref<8x4xf32, #tpu.memory_space<smem>>
    %148 = vector.broadcast %147 : f32 to vector<4x128xf32>
    %149 = arith.mulf %134, %148 : vector<4x128xf32>
    %150 = arith.addf %130, %149 : vector<4x128xf32>
    %c5_i32 = arith.constant 5 : i32
    %151 = vector.broadcast %c5_i32 : i32 to vector<4x128xi32>
    %152 = arith.cmpi eq, %46, %151 : vector<4x128xi32>
    %153 = arith.extui %152 : vector<4x128xi1> to vector<4x128xi32>
    %154 = arith.sitofp %153 : vector<4x128xi32> to vector<4x128xf32>
    %c5 = arith.constant 5 : index
    %c0_65 = arith.constant 0 : index
    %155 = memref.load %arg1[%c5, %c0_65] : memref<8x4xf32, #tpu.memory_space<smem>>
    %156 = vector.broadcast %155 : f32 to vector<4x128xf32>
    %157 = arith.mulf %154, %156 : vector<4x128xf32>
    %158 = arith.addf %138, %157 : vector<4x128xf32>
    %c5_66 = arith.constant 5 : index
    %c1_67 = arith.constant 1 : index
    %159 = memref.load %arg1[%c5_66, %c1_67] : memref<8x4xf32, #tpu.memory_space<smem>>
    %160 = vector.broadcast %159 : f32 to vector<4x128xf32>
    %161 = arith.mulf %154, %160 : vector<4x128xf32>
    %162 = arith.addf %142, %161 : vector<4x128xf32>
    %c5_68 = arith.constant 5 : index
    %c2_69 = arith.constant 2 : index
    %163 = memref.load %arg1[%c5_68, %c2_69] : memref<8x4xf32, #tpu.memory_space<smem>>
    %164 = vector.broadcast %163 : f32 to vector<4x128xf32>
    %165 = arith.mulf %154, %164 : vector<4x128xf32>
    %166 = arith.addf %146, %165 : vector<4x128xf32>
    %c5_70 = arith.constant 5 : index
    %c3_71 = arith.constant 3 : index
    %167 = memref.load %arg1[%c5_70, %c3_71] : memref<8x4xf32, #tpu.memory_space<smem>>
    %168 = vector.broadcast %167 : f32 to vector<4x128xf32>
    %169 = arith.mulf %154, %168 : vector<4x128xf32>
    %170 = arith.addf %150, %169 : vector<4x128xf32>
    %c6_i32 = arith.constant 6 : i32
    %171 = vector.broadcast %c6_i32 : i32 to vector<4x128xi32>
    %172 = arith.cmpi eq, %46, %171 : vector<4x128xi32>
    %173 = arith.extui %172 : vector<4x128xi1> to vector<4x128xi32>
    %174 = arith.sitofp %173 : vector<4x128xi32> to vector<4x128xf32>
    %c6 = arith.constant 6 : index
    %c0_72 = arith.constant 0 : index
    %175 = memref.load %arg1[%c6, %c0_72] : memref<8x4xf32, #tpu.memory_space<smem>>
    %176 = vector.broadcast %175 : f32 to vector<4x128xf32>
    %177 = arith.mulf %174, %176 : vector<4x128xf32>
    %178 = arith.addf %158, %177 : vector<4x128xf32>
    %c6_73 = arith.constant 6 : index
    %c1_74 = arith.constant 1 : index
    %179 = memref.load %arg1[%c6_73, %c1_74] : memref<8x4xf32, #tpu.memory_space<smem>>
    %180 = vector.broadcast %179 : f32 to vector<4x128xf32>
    %181 = arith.mulf %174, %180 : vector<4x128xf32>
    %182 = arith.addf %162, %181 : vector<4x128xf32>
    %c6_75 = arith.constant 6 : index
    %c2_76 = arith.constant 2 : index
    %183 = memref.load %arg1[%c6_75, %c2_76] : memref<8x4xf32, #tpu.memory_space<smem>>
    %184 = vector.broadcast %183 : f32 to vector<4x128xf32>
    %185 = arith.mulf %174, %184 : vector<4x128xf32>
    %186 = arith.addf %166, %185 : vector<4x128xf32>
    %c6_77 = arith.constant 6 : index
    %c3_78 = arith.constant 3 : index
    %187 = memref.load %arg1[%c6_77, %c3_78] : memref<8x4xf32, #tpu.memory_space<smem>>
    %188 = vector.broadcast %187 : f32 to vector<4x128xf32>
    %189 = arith.mulf %174, %188 : vector<4x128xf32>
    %190 = arith.addf %170, %189 : vector<4x128xf32>
    %c7_i32 = arith.constant 7 : i32
    %191 = vector.broadcast %c7_i32 : i32 to vector<4x128xi32>
    %192 = arith.cmpi eq, %46, %191 : vector<4x128xi32>
    %193 = arith.extui %192 : vector<4x128xi1> to vector<4x128xi32>
    %194 = arith.sitofp %193 : vector<4x128xi32> to vector<4x128xf32>
    %c7 = arith.constant 7 : index
    %c0_79 = arith.constant 0 : index
    %195 = memref.load %arg1[%c7, %c0_79] : memref<8x4xf32, #tpu.memory_space<smem>>
    %196 = vector.broadcast %195 : f32 to vector<4x128xf32>
    %197 = arith.mulf %194, %196 : vector<4x128xf32>
    %198 = arith.addf %178, %197 : vector<4x128xf32>
    %c7_80 = arith.constant 7 : index
    %c1_81 = arith.constant 1 : index
    %199 = memref.load %arg1[%c7_80, %c1_81] : memref<8x4xf32, #tpu.memory_space<smem>>
    %200 = vector.broadcast %199 : f32 to vector<4x128xf32>
    %201 = arith.mulf %194, %200 : vector<4x128xf32>
    %202 = arith.addf %182, %201 : vector<4x128xf32>
    %c7_82 = arith.constant 7 : index
    %c2_83 = arith.constant 2 : index
    %203 = memref.load %arg1[%c7_82, %c2_83] : memref<8x4xf32, #tpu.memory_space<smem>>
    %204 = vector.broadcast %203 : f32 to vector<4x128xf32>
    %205 = arith.mulf %194, %204 : vector<4x128xf32>
    %206 = arith.addf %186, %205 : vector<4x128xf32>
    %c7_84 = arith.constant 7 : index
    %c3_85 = arith.constant 3 : index
    %207 = memref.load %arg1[%c7_84, %c3_85] : memref<8x4xf32, #tpu.memory_space<smem>>
    %208 = vector.broadcast %207 : f32 to vector<4x128xf32>
    %209 = arith.mulf %194, %208 : vector<4x128xf32>
    %210 = arith.addf %190, %209 : vector<4x128xf32>
    %c0_i32_86 = arith.constant 0 : i32
    %c0_i32_87 = arith.constant 0 : i32
    %c0_i32_88 = arith.constant 0 : i32
    %211 = tpu.memref_slice %arg4[%c0_i32_86, %c0_i32_87, %c0_i32_88] : memref<4x4x128xf32, #tpu.memory_space<vmem>> -> memref<1x4x128xf32, #tpu.memory_space<vmem>>
    %212 = tpu.memref_squeeze %211 : memref<1x4x128xf32, #tpu.memory_space<vmem>> -> memref<4x128xf32, #tpu.memory_space<vmem>>
    %c0_89 = arith.constant 0 : index
    %c0_90 = arith.constant 0 : index
    %213 = vector.load %212[%c0_89, %c0_90] : memref<4x128xf32, #tpu.memory_space<vmem>>, vector<4x128xf32>
    %c1_i32_91 = arith.constant 1 : i32
    %c0_i32_92 = arith.constant 0 : i32
    %c0_i32_93 = arith.constant 0 : i32
    %214 = tpu.memref_slice %arg4[%c1_i32_91, %c0_i32_92, %c0_i32_93] : memref<4x4x128xf32, #tpu.memory_space<vmem>> -> memref<1x4x128xf32, #tpu.memory_space<vmem>>
    %215 = tpu.memref_squeeze %214 : memref<1x4x128xf32, #tpu.memory_space<vmem>> -> memref<4x128xf32, #tpu.memory_space<vmem>>
    %c0_94 = arith.constant 0 : index
    %c0_95 = arith.constant 0 : index
    %216 = vector.load %215[%c0_94, %c0_95] : memref<4x128xf32, #tpu.memory_space<vmem>>, vector<4x128xf32>
    %c2_i32_96 = arith.constant 2 : i32
    %c0_i32_97 = arith.constant 0 : i32
    %c0_i32_98 = arith.constant 0 : i32
    %217 = tpu.memref_slice %arg4[%c2_i32_96, %c0_i32_97, %c0_i32_98] : memref<4x4x128xf32, #tpu.memory_space<vmem>> -> memref<1x4x128xf32, #tpu.memory_space<vmem>>
    %218 = tpu.memref_squeeze %217 : memref<1x4x128xf32, #tpu.memory_space<vmem>> -> memref<4x128xf32, #tpu.memory_space<vmem>>
    %c0_99 = arith.constant 0 : index
    %c0_100 = arith.constant 0 : index
    %219 = vector.load %218[%c0_99, %c0_100] : memref<4x128xf32, #tpu.memory_space<vmem>>, vector<4x128xf32>
    %c3_i32_101 = arith.constant 3 : i32
    %c0_i32_102 = arith.constant 0 : i32
    %c0_i32_103 = arith.constant 0 : i32
    %220 = tpu.memref_slice %arg4[%c3_i32_101, %c0_i32_102, %c0_i32_103] : memref<4x4x128xf32, #tpu.memory_space<vmem>> -> memref<1x4x128xf32, #tpu.memory_space<vmem>>
    %221 = tpu.memref_squeeze %220 : memref<1x4x128xf32, #tpu.memory_space<vmem>> -> memref<4x128xf32, #tpu.memory_space<vmem>>
    %c0_104 = arith.constant 0 : index
    %c0_105 = arith.constant 0 : index
    %222 = vector.load %221[%c0_104, %c0_105] : memref<4x128xf32, #tpu.memory_space<vmem>>, vector<4x128xf32>
    %223 = arith.subf %219, %213 : vector<4x128xf32>
    %224 = arith.subf %222, %216 : vector<4x128xf32>
    %cst_106 = arith.constant 0.000000e+00 : f32
    %225 = vector.broadcast %cst_106 : f32 to vector<4x128xf32>
    %226 = arith.cmpf ogt, %5, %225 : vector<4x128xf32>
    %cst_107 = arith.constant 1.000000e+00 : f32
    %227 = vector.broadcast %cst_107 : f32 to vector<4x128xf32>
    %228 = arith.select %226, %223, %227 : vector<4x128xi1>, vector<4x128xf32>
    %229 = tpu.reciprocal %228 : vector<4x128xf32> -> vector<4x128xf32>
    %cst_108 = arith.constant 1.000000e+00 : f32
    %230 = vector.broadcast %cst_108 : f32 to vector<4x128xf32>
    %231 = arith.select %226, %224, %230 : vector<4x128xi1>, vector<4x128xf32>
    %232 = tpu.reciprocal %231 : vector<4x128xf32> -> vector<4x128xf32>
    %cst_109 = arith.constant 5.000000e-01 : f32
    %233 = vector.broadcast %cst_109 : f32 to vector<4x128xf32>
    %234 = arith.mulf %223, %233 : vector<4x128xf32>
    %235 = arith.addf %213, %234 : vector<4x128xf32>
    %cst_110 = arith.constant 5.000000e-01 : f32
    %236 = vector.broadcast %cst_110 : f32 to vector<4x128xf32>
    %237 = arith.mulf %224, %236 : vector<4x128xf32>
    %238 = arith.addf %216, %237 : vector<4x128xf32>
    %239 = arith.subf %206, %198 : vector<4x128xf32>
    %240 = arith.subf %210, %202 : vector<4x128xf32>
    %cst_111 = arith.constant 5.000000e-01 : f32
    %241 = vector.broadcast %cst_111 : f32 to vector<4x128xf32>
    %242 = arith.mulf %239, %241 : vector<4x128xf32>
    %243 = arith.addf %198, %242 : vector<4x128xf32>
    %cst_112 = arith.constant 5.000000e-01 : f32
    %244 = vector.broadcast %cst_112 : f32 to vector<4x128xf32>
    %245 = arith.mulf %240, %244 : vector<4x128xf32>
    %246 = arith.addf %202, %245 : vector<4x128xf32>
    %247 = arith.subf %243, %235 : vector<4x128xf32>
    %248 = arith.mulf %247, %229 : vector<4x128xf32>
    %249 = arith.subf %246, %238 : vector<4x128xf32>
    %250 = arith.mulf %249, %232 : vector<4x128xf32>
    %251 = arith.mulf %239, %229 : vector<4x128xf32>
    %cst_113 = arith.constant 1.000000e+00 : f32
    %252 = vector.broadcast %cst_113 : f32 to vector<4x128xf32>
    %253 = arith.select %226, %251, %252 : vector<4x128xi1>, vector<4x128xf32>
    %254 = math.log %253 : vector<4x128xf32>
    %255 = arith.mulf %240, %232 : vector<4x128xf32>
    %cst_114 = arith.constant 1.000000e+00 : f32
    %256 = vector.broadcast %cst_114 : f32 to vector<4x128xf32>
    %257 = arith.select %226, %255, %256 : vector<4x128xi1>, vector<4x128xf32>
    %258 = math.log %257 : vector<4x128xf32>
    %c0_i32_115 = arith.constant 0 : i32
    %c0_i32_116 = arith.constant 0 : i32
    %c0_i32_117 = arith.constant 0 : i32
    %259 = tpu.memref_slice %arg3[%c0_i32_115, %c0_i32_116, %c0_i32_117] : memref<4x4x128xf32, #tpu.memory_space<vmem>> -> memref<1x4x128xf32, #tpu.memory_space<vmem>>
    %260 = tpu.memref_squeeze %259 : memref<1x4x128xf32, #tpu.memory_space<vmem>> -> memref<4x128xf32, #tpu.memory_space<vmem>>
    %c0_118 = arith.constant 0 : index
    %c0_119 = arith.constant 0 : index
    %261 = vector.load %260[%c0_118, %c0_119] : memref<4x128xf32, #tpu.memory_space<vmem>>, vector<4x128xf32>
    %262 = arith.subf %261, %248 : vector<4x128xf32>
    %263 = math.absf %262 : vector<4x128xf32>
    %cst_120 = arith.constant 1.000000e+00 : f32
    %264 = vector.broadcast %cst_120 : f32 to vector<4x128xf32>
    %265 = arith.cmpf olt, %263, %264 : vector<4x128xf32>
    %cst_121 = arith.constant 5.000000e-01 : f32
    %266 = vector.broadcast %cst_121 : f32 to vector<4x128xf32>
    %267 = arith.mulf %266, %263 : vector<4x128xf32>
    %268 = arith.mulf %267, %263 : vector<4x128xf32>
    %cst_122 = arith.constant 5.000000e-01 : f32
    %269 = vector.broadcast %cst_122 : f32 to vector<4x128xf32>
    %270 = arith.subf %263, %269 : vector<4x128xf32>
    %271 = arith.select %265, %268, %270 : vector<4x128xi1>, vector<4x128xf32>
    %c1_i32_123 = arith.constant 1 : i32
    %c0_i32_124 = arith.constant 0 : i32
    %c0_i32_125 = arith.constant 0 : i32
    %272 = tpu.memref_slice %arg3[%c1_i32_123, %c0_i32_124, %c0_i32_125] : memref<4x4x128xf32, #tpu.memory_space<vmem>> -> memref<1x4x128xf32, #tpu.memory_space<vmem>>
    %273 = tpu.memref_squeeze %272 : memref<1x4x128xf32, #tpu.memory_space<vmem>> -> memref<4x128xf32, #tpu.memory_space<vmem>>
    %c0_126 = arith.constant 0 : index
    %c0_127 = arith.constant 0 : index
    %274 = vector.load %273[%c0_126, %c0_127] : memref<4x128xf32, #tpu.memory_space<vmem>>, vector<4x128xf32>
    %275 = arith.subf %274, %250 : vector<4x128xf32>
    %276 = math.absf %275 : vector<4x128xf32>
    %cst_128 = arith.constant 1.000000e+00 : f32
    %277 = vector.broadcast %cst_128 : f32 to vector<4x128xf32>
    %278 = arith.cmpf olt, %276, %277 : vector<4x128xf32>
    %cst_129 = arith.constant 5.000000e-01 : f32
    %279 = vector.broadcast %cst_129 : f32 to vector<4x128xf32>
    %280 = arith.mulf %279, %276 : vector<4x128xf32>
    %281 = arith.mulf %280, %276 : vector<4x128xf32>
    %cst_130 = arith.constant 5.000000e-01 : f32
    %282 = vector.broadcast %cst_130 : f32 to vector<4x128xf32>
    %283 = arith.subf %276, %282 : vector<4x128xf32>
    %284 = arith.select %278, %281, %283 : vector<4x128xi1>, vector<4x128xf32>
    %285 = arith.addf %271, %284 : vector<4x128xf32>
    %c2_i32_131 = arith.constant 2 : i32
    %c0_i32_132 = arith.constant 0 : i32
    %c0_i32_133 = arith.constant 0 : i32
    %286 = tpu.memref_slice %arg3[%c2_i32_131, %c0_i32_132, %c0_i32_133] : memref<4x4x128xf32, #tpu.memory_space<vmem>> -> memref<1x4x128xf32, #tpu.memory_space<vmem>>
    %287 = tpu.memref_squeeze %286 : memref<1x4x128xf32, #tpu.memory_space<vmem>> -> memref<4x128xf32, #tpu.memory_space<vmem>>
    %c0_134 = arith.constant 0 : index
    %c0_135 = arith.constant 0 : index
    %288 = vector.load %287[%c0_134, %c0_135] : memref<4x128xf32, #tpu.memory_space<vmem>>, vector<4x128xf32>
    %289 = arith.subf %288, %254 : vector<4x128xf32>
    %290 = math.absf %289 : vector<4x128xf32>
    %cst_136 = arith.constant 1.000000e+00 : f32
    %291 = vector.broadcast %cst_136 : f32 to vector<4x128xf32>
    %292 = arith.cmpf olt, %290, %291 : vector<4x128xf32>
    %cst_137 = arith.constant 5.000000e-01 : f32
    %293 = vector.broadcast %cst_137 : f32 to vector<4x128xf32>
    %294 = arith.mulf %293, %290 : vector<4x128xf32>
    %295 = arith.mulf %294, %290 : vector<4x128xf32>
    %cst_138 = arith.constant 5.000000e-01 : f32
    %296 = vector.broadcast %cst_138 : f32 to vector<4x128xf32>
    %297 = arith.subf %290, %296 : vector<4x128xf32>
    %298 = arith.select %292, %295, %297 : vector<4x128xi1>, vector<4x128xf32>
    %299 = arith.addf %285, %298 : vector<4x128xf32>
    %c3_i32_139 = arith.constant 3 : i32
    %c0_i32_140 = arith.constant 0 : i32
    %c0_i32_141 = arith.constant 0 : i32
    %300 = tpu.memref_slice %arg3[%c3_i32_139, %c0_i32_140, %c0_i32_141] : memref<4x4x128xf32, #tpu.memory_space<vmem>> -> memref<1x4x128xf32, #tpu.memory_space<vmem>>
    %301 = tpu.memref_squeeze %300 : memref<1x4x128xf32, #tpu.memory_space<vmem>> -> memref<4x128xf32, #tpu.memory_space<vmem>>
    %c0_142 = arith.constant 0 : index
    %c0_143 = arith.constant 0 : index
    %302 = vector.load %301[%c0_142, %c0_143] : memref<4x128xf32, #tpu.memory_space<vmem>>, vector<4x128xf32>
    %303 = arith.subf %302, %258 : vector<4x128xf32>
    %304 = math.absf %303 : vector<4x128xf32>
    %cst_144 = arith.constant 1.000000e+00 : f32
    %305 = vector.broadcast %cst_144 : f32 to vector<4x128xf32>
    %306 = arith.cmpf olt, %304, %305 : vector<4x128xf32>
    %cst_145 = arith.constant 5.000000e-01 : f32
    %307 = vector.broadcast %cst_145 : f32 to vector<4x128xf32>
    %308 = arith.mulf %307, %304 : vector<4x128xf32>
    %309 = arith.mulf %308, %304 : vector<4x128xf32>
    %cst_146 = arith.constant 5.000000e-01 : f32
    %310 = vector.broadcast %cst_146 : f32 to vector<4x128xf32>
    %311 = arith.subf %304, %310 : vector<4x128xf32>
    %312 = arith.select %306, %309, %311 : vector<4x128xi1>, vector<4x128xf32>
    %313 = arith.addf %299, %312 : vector<4x128xf32>
    %314 = arith.mulf %5, %313 : vector<4x128xf32>
    %315 = vector.shape_cast %314 : vector<4x128xf32> to vector<1x4x128xf32>
    %cst_147 = arith.constant dense<0.000000e+00> : vector<1xf32>
    %316 = vector.multi_reduction <add>, %315, %cst_147 [1, 2] : vector<1x4x128xf32> to vector<1xf32>
    %317 = vector.shape_cast %316 : vector<1xf32> to vector<1x1x1xf32>
    %318 = vector.extract %317[0, 0, 0] : f32 from vector<1x1x1xf32>
    %319 = vector.broadcast %318 : f32 to vector<1x1xf32>
    %320 = arith.addf %2, %319 : vector<1x1xf32>
    %321 = tpu.iota {dimensions = array<i32: 1>} : vector<8x128xi32>
    %322 = tpu.iota {dimensions = array<i32: 0>} : vector<8x128xi32>
    %c0_i32_148 = arith.constant 0 : i32
    %323 = vector.broadcast %c0_i32_148 : i32 to vector<8x128xi32>
    %324 = arith.cmpi eq, %322, %323 : vector<8x128xi32>
    %c0_i32_149 = arith.constant 0 : i32
    %325 = vector.broadcast %c0_i32_149 : i32 to vector<8x128xi32>
    %326 = arith.cmpi eq, %321, %325 : vector<8x128xi32>
    %327 = arith.andi %324, %326 : vector<8x128xi1>
    %c1_i32_150 = arith.constant 1 : i32
    %328 = vector.broadcast %c1_i32_150 : i32 to vector<8x128xi32>
    %329 = arith.cmpi eq, %321, %328 : vector<8x128xi32>
    %330 = arith.andi %324, %329 : vector<8x128xi1>
    %c2_i32_151 = arith.constant 2 : i32
    %331 = vector.broadcast %c2_i32_151 : i32 to vector<8x128xi32>
    %332 = arith.cmpi eq, %321, %331 : vector<8x128xi32>
    %333 = arith.andi %324, %332 : vector<8x128xi1>
    %cst_152 = arith.constant 0.000000e+00 : f32
    %334 = vector.shape_cast %320 : vector<1x1xf32> to vector<1x1xf32>
    %335 = vector.broadcast %334 : vector<1x1xf32> to vector<8x128xf32>
    %336 = vector.broadcast %cst_152 : f32 to vector<8x128xf32>
    %337 = arith.select %333, %335, %336 : vector<8x128xi1>, vector<8x128xf32>
    %338 = vector.shape_cast %45 : vector<1x1xf32> to vector<1x1xf32>
    %339 = vector.broadcast %338 : vector<1x1xf32> to vector<8x128xf32>
    %340 = arith.select %330, %339, %337 : vector<8x128xi1>, vector<8x128xf32>
    %341 = vector.shape_cast %33 : vector<1x1xf32> to vector<1x1xf32>
    %342 = vector.broadcast %341 : vector<1x1xf32> to vector<8x128xf32>
    %343 = arith.select %327, %342, %340 : vector<8x128xi1>, vector<8x128xf32>
    %c0_153 = arith.constant 0 : index
    %c0_154 = arith.constant 0 : index
    %344 = vector.load %arg7[%c0_153, %c0_154] : memref<8x128xf32, #tpu.memory_space<vmem>>, vector<8x128xf32>
    tpu.vector_store %arg7[%c0_153, %c0_154], %343 {strides = array<i32>} : memref<8x128xf32, #tpu.memory_space<vmem>>, vector<8x128xf32>,
    return
  }
  func.func @transform_0(%arg0: i32) -> (i32, i32) {
    %c0_i32 = arith.constant 0 : i32
    %c0_i32_0 = arith.constant 0 : i32
    %c0_i32_1 = arith.constant 0 : i32
    return %c0_i32, %c0_i32_0 : i32, i32
  }
  func.func @transform_1(%arg0: i32) -> (i32, i32, i32) {
    %c0_i32 = arith.constant 0 : i32
    %c0_i32_0 = arith.constant 0 : i32
    %c0_i32_1 = arith.constant 0 : i32
    return %c0_i32, %arg0, %c0_i32_0 : i32, i32, i32
  }
  func.func @transform_2(%arg0: i32) -> (i32, i32, i32) {
    %c0_i32 = arith.constant 0 : i32
    %c0_i32_0 = arith.constant 0 : i32
    %c0_i32_1 = arith.constant 0 : i32
    return %c0_i32, %arg0, %c0_i32_0 : i32, i32, i32
  }
  func.func @transform_3(%arg0: i32) -> (i32, i32, i32) {
    %c0_i32 = arith.constant 0 : i32
    %c0_i32_0 = arith.constant 0 : i32
    %c0_i32_1 = arith.constant 0 : i32
    return %c0_i32, %arg0, %c0_i32_0 : i32, i32, i32
  }
  func.func @transform_4(%arg0: i32) -> (i32, i32) {
    %c0_i32 = arith.constant 0 : i32
    %c0_i32_0 = arith.constant 0 : i32
    return %arg0, %c0_i32 : i32, i32
  }
  func.func @transform_5(%arg0: i32) -> (i32, i32) {
    %c0_i32 = arith.constant 0 : i32
    %c0_i32_0 = arith.constant 0 : i32
    return %arg0, %c0_i32 : i32, i32
  }
  func.func @transform_6(%arg0: i32) -> (i32, i32) {
    %c0_i32 = arith.constant 0 : i32
    %c0_i32_0 = arith.constant 0 : i32
    return %arg0, %c0_i32 : i32, i32
  }
}

</mosaic_0001>

<bundles_post_ra>
// kernel: anchor_target_layer.2
= control target key start
LH: loop header
LB: loop body
LE: loop exit
PB: predicated region body
PF: predicated region fallthrough
CT: control target
= control target key end

     0   :  { %11 = vsyncpa [#allocation3], 0  ;;  %s714_s0 = inlined_call_operand.vmem [shape: f32[8,4], index: 0, kind: input, shape index: {}]   ;;  %s715_s1 = inlined_call_operand.hbm [shape: f32[4,4,128], index: 1, kind: input, shape index: {}]   ;;  %s716_s2 = inlined_call_operand.vmem [shape: f32[4,128], index: 2, kind: output, shape index: {0}]   ;;  %s717_s3 = inlined_call_operand.vmem [shape: s32[4,128], index: 3, kind: output, shape index: {1}]   ;;  %s718_s4 = inlined_call_operand.hbm [shape: f32[8,128], index: 4, kind: output, shape index: {2}]   ;;  %s719_s5 = inlined_call_operand.vmem [shape: s32[8,128], index: 5, kind: output, shape index: {3}]  }
   0x1   :  { %12 = vsyncpa [#allocation4], 0  ;;  %s505_s18 = smov [#allocation2]  }
   0x2   :  { %s20_s19 = sshll.u32 %s505_s18, 4  ;;  %s21_s19 = int_to_ptr.vmem [resolvable:$true] %s20_s19 }
   0x3   :  { %s469_s20 = scalar_lea.vmem %s21_s19, 256  ;;  %p474_p1 = scmp.lt.s32.totalorder %s21_s19, %s21_s19 }
   0x4   :  { %p470_p0 = scmp.ne.s32.totalorder %s21_s19, %s469_s20  ;;  %p475_p2 = scmp.lt.s32.totalorder %s469_s20, %s469_s20 }
   0x6   :  { %p476_p3 = por %p475_p2, %p474_p1 }
   0x8   :  { %p477_p4 = pnand %p476_p3, %p470_p0 }
   0xa   :  { %480 = shalt.err (!%p477_p4)
}
   0xb   :  { %s506_s21 = smov 64   ;;  %s507_s22 = smov 4  }
   0xc   :  { %26 = dma.hbm_to_vmem [thread:$0]  %s715_s1, 256, %s21_s19, [#allocation3], %s506_s21, %s506_s21, %s507_s22  }
   0xd   :  { %501 = dma.done.wait [#allocation3], 256  }
   0xe   :  { %502 = vsyncadd [#allocation3], 4294967040  ;;  %v508_v0 = vmov 2   ;;  %v509_v1 = vmov 3   ;;  %v30_v2 = vld [vmem:[%s714_s0] sm:$0xff]  ;;  %s510_s27 = smov 2   ;;  %v41_v9 = vlaneseq }
   0xf   :  { %447 = vset.pattern.permute.xlu1 %v508_v0  ;;  %449 = vset.pattern.permute.xlu0 %v509_v1  ;;  %v511_v3 = vmov 0   ;;  %v512_v4 = vmov 1   ;;  %s513_s1 = smov 127   ;;  %v554_v12 = vld [vmem:[#allocation2 + $0x8] sm:$0x1]  ;;  %vm397_vm0 = vcmask 1040384  }
  0x10   :  { %32 = vrot.lane.b32.xlu0 %v30_v2, %s510_s27  ;;  %58 = vperm.xlu1 %447, %v30_v2   ;;  %v552_v11 = vshrl.u32 %v41_v9, 7  ;;  %v556_v13 = vld [vmem:[#allocation2 + $0x9] sm:$0x1]  ;;  %v561_v15 = vld [vmem:[#allocation2 + $0xa] sm:$0x1]  ;;  %vm399_vm1 = vcmask 1041408  }
  0x11   :  { %v563_v16 = vld [vmem:[#allocation2 + $0xb] sm:$0x1]  ;;  %v565_v17 = vld [vmem:[#allocation2] sm:$0x1]  ;;  %v567_v18 = vld [vmem:[#allocation2 + $0x1] sm:$0x1] }
  0x12   :  { %v559_v14 = vsub.s32 0, %v552_v11  ;;  %v569_v19 = vld [vmem:[#allocation2 + $0x2] sm:$0x1]  ;;  %v571_v21 = vld [vmem:[#allocation2 + $0x3] sm:$0x1]  ;;  %v94_v24 = vsub.f32 %v554_v12, %v565_v17  ;;  %v180_v25 = vsub.f32 %v556_v13, %v567_v18  ;;  %vm401_vm2 = vcmask 1042432  }
  0x13   :  { %v48_v22 = vld [vmem:[#allocation2 + $0x4] sm:$0x1]  ;;  %v152_v23 = vld [vmem:[#allocation2 + $0x5] sm:$0x1]  ;;  %v262_v26 = vsub.f32 %v561_v15, %v569_v19  ;;  %v344_v27 = vsub.f32 %v563_v16, %v571_v21  ;;  %v234_v28 = vld [vmem:[#allocation2 + $0x6] sm:$0x1] }
  0x14   :  { %448 = vset.pattern.permute.xlu1 %v511_v3  ;;  %v316_v29 = vld [vmem:[#allocation2 + $0x7] sm:$0x1]  ;;  %v52_v30 = vld [vmem:[#allocation2 + $0xc] sm:$0x1]  ;;  %v56_v31 = vrot.slane %v554_v12, %v559_v14  ;;  %v158_v32 = vrot.slane %v556_v13, %v559_v14  ;;  %v240_v33 = vrot.slane %v561_v15, %v559_v14  ;;  %v322_v34 = vrot.slane %v563_v16, %v559_v14  ;;  %v154_v35 = vld [vmem:[#allocation2 + $0xd] sm:$0x1] }
  0x15   :  { %67 = vperm.xlu1 %448, %v30_v2   ;;  %v236_v36 = vld [vmem:[#allocation2 + $0xe] sm:$0x1]  ;;  %v318_v37 = vld [vmem:[#allocation2 + $0xf] sm:$0x1]  ;;  %v65_v38 = vrot.slane %v565_v17, %v559_v14  ;;  %v163_v39 = vrot.slane %v567_v18, %v559_v14  ;;  %v245_v40 = vrot.slane %v569_v19, %v559_v14  ;;  %v327_v41 = vrot.slane %v571_v21, %v559_v14 }
  0x16   :  { %v85_v42 = vrot.slane %v48_v22, %v559_v14  ;;  %v175_v43 = vrot.slane %v152_v23, %v559_v14  ;;  %v257_v44 = vrot.slane %v234_v28, %v559_v14  ;;  %v339_v45 = vrot.slane %v316_v29, %v559_v14 }
  0x17   :  { %v76_v47 = vrot.slane %v52_v30, %v559_v14  ;;  %v170_v48 = vrot.slane %v154_v35, %v559_v14  ;;  %v252_v49 = vrot.slane %v236_v36, %v559_v14  ;;  %v334_v50 = vrot.slane %v318_v37, %v559_v14 }
  0x19   :  { %450 = vset.pattern.permute.xlu1 %v512_v4  ;;  %v95_v4 = vsub.f32 %v52_v30, %v48_v22 }
  0x1a   :  { %87 = vperm.xlu1 %450, %v30_v2  }
  0x1b   :  { %v96_v19 = vmul.f32 %v95_v4, %v94_v24 }
  0x1d   :  { %v100_v30 = vrot.slane %v96_v19, %v559_v14 }
  0x1e   :  { %451 = vset.pattern.permute.xlu1 %v508_v0 }
  0x82   :  { %v33_v5 = vpop.permute.xlu0 %32 }
  0x83   :  { %v35_v6 = vsub.f32 %v30_v2, %v33_v5  ;;  %v181_v5 = vsub.f32 %v154_v35, %v152_v23 }
  0x85   :  { %37 = vrot.lane.b32.xlu0 %v35_v6, %s513_s1 }
  0x89   :  { %78 = vperm.xlu0 %449, %v30_v2  }
  0x8b   :  { %v59_v10 = vpop.permute.xlu1 %58 }
  0x8c   :  { %v61_v51 = vmin.f32 %v56_v31, %v59_v10  ;;  %v159_v52 = vmin.f32 %v158_v32, %v59_v10  ;;  %v241_v53 = vmin.f32 %v240_v33, %v59_v10  ;;  %v323_v54 = vmin.f32 %v322_v34, %v59_v10 }
  0x8d   :  { %452 = vset.pattern.permute.xlu0 %v508_v0 }
  0x90   :  { %v68_v20 = vpop.permute.xlu1 %67 }
  0x91   :  { %v70_v56 = vmax.f32 %v65_v38, %v68_v20  ;;  %v164_v57 = vmax.f32 %v163_v39, %v68_v20  ;;  %v246_v58 = vmax.f32 %v245_v40, %v68_v20  ;;  %v328_v59 = vmax.f32 %v327_v41, %v68_v20 }
  0x92   :  { %v182_v20 = vmul.f32 %v181_v5, %v180_v25 }
  0x93   :  { %v165_v12 = vsub.f32 %v159_v52, %v164_v57  ;;  %v247_v10 = vsub.f32 %v241_v53, %v246_v58  ;;  %v329_v13 = vsub.f32 %v323_v54, %v328_v59 }
  0x94   :  { %v186_v35 = vrot.slane %v182_v20, %v559_v14 }
  0x95   :  { %v88_v46 = vpop.permute.xlu1 %87  ;;  %v166_v33 = vmax.f32 %v165_v12, 0.0  ;;  %v248_v34 = vmax.f32 %v247_v10, 0.0  ;;  %v330_v38 = vmax.f32 %v329_v13, 0.0 }
  0x96   :  { %v90_v60 = vmax.f32 %v85_v42, %v88_v46  ;;  %v176_v61 = vmax.f32 %v175_v43, %v88_v46  ;;  %v258_v62 = vmax.f32 %v257_v44, %v88_v46  ;;  %v340_v63 = vmax.f32 %v339_v45, %v88_v46 }
  0xf7   :  { %v38_v7 = vpop.permute.xlu0 %37 }
  0xf8   :  { %v40_v8 = vmul.f32 %v38_v7, %v35_v6  ;;  %v263_v6 = vsub.f32 %v236_v36, %v234_v28  ;;  %v345_v7 = vsub.f32 %v318_v37, %v316_v29 }
  0xfa   :  { %103 = vperm.xlu1 %451, %v40_v8   ;;  %v71_v8 = vsub.f32 %v61_v51, %v70_v56  ;;  %v264_v21 = vmul.f32 %v263_v6, %v262_v26  ;;  %v346_v31 = vmul.f32 %v345_v7, %v344_v27 }
  0xfc   :  { %v72_v32 = vmax.f32 %v71_v8, 0.0  ;;  %v268_v36 = vrot.slane %v264_v21, %v559_v14  ;;  %v350_v37 = vrot.slane %v346_v31, %v559_v14 }
 0x104   :  { %v79_v55 = vpop.permute.xlu0 %78 }
 0x105   :  { %v81_v0 = vmin.f32 %v76_v47, %v79_v55  ;;  %v171_v1 = vmin.f32 %v170_v48, %v79_v55  ;;  %v253_v2 = vmin.f32 %v252_v49, %v79_v55  ;;  %v335_v3 = vmin.f32 %v334_v50, %v79_v55 }
 0x107   :  { %v91_v15 = vsub.f32 %v81_v0, %v90_v60  ;;  %v177_v16 = vsub.f32 %v171_v1, %v176_v61  ;;  %v259_v17 = vsub.f32 %v253_v2, %v258_v62  ;;  %v341_v18 = vsub.f32 %v335_v3, %v340_v63 }
 0x109   :  { %v92_v22 = vmax.f32 %v91_v15, 0.0  ;;  %v178_v23 = vmax.f32 %v177_v16, 0.0  ;;  %v260_v28 = vmax.f32 %v259_v17, 0.0  ;;  %v342_v29 = vmax.f32 %v341_v18, 0.0 }
 0x10b   :  { %v93_v25 = vmul.f32 %v92_v22, %v72_v32  ;;  %v179_v26 = vmul.f32 %v178_v23, %v166_v33  ;;  %v261_v27 = vmul.f32 %v260_v28, %v248_v34  ;;  %v343_v39 = vmul.f32 %v342_v29, %v330_v38 }
 0x175   :  { %v104_v24 = vpop.permute.xlu1 %103 }
 0x176   :  { %v106_v40 = vadd.f32 %v104_v24, %v100_v30  ;;  %v187_v41 = vadd.f32 %v186_v35, %v104_v24  ;;  %v269_v42 = vadd.f32 %v268_v36, %v104_v24  ;;  %v351_v43 = vadd.f32 %v350_v37, %v104_v24 }
 0x178   :  { %v107_v44 = vsub.f32 %v106_v40, %v93_v25  ;;  %v188_v45 = vsub.f32 %v187_v41, %v179_v26  ;;  %v270_v46 = vsub.f32 %v269_v42, %v261_v27  ;;  %v352_v47 = vsub.f32 %v351_v43, %v343_v39 }
 0x17a   :  { %v108_v48 = vmax.f32 %v107_v44, 1e-12  ;;  %v189_v49 = vmax.f32 %v188_v45, 1e-12  ;;  %v271_v50 = vmax.f32 %v270_v46, 1e-12 }
 0x17b   :  { %v353_v51 = vmax.f32 %v352_v47, 1e-12 }
 0x17c   :  { %453 = vrcp.f32 %v108_v48 }
 0x17d   :  { %455 = vrcp.f32 %v189_v49 }
 0x17e   :  { %457 = vrcp.f32 %v271_v50 }
 0x17f   :  { %459 = vrcp.f32 %v353_v51 }
 0x189   :  { %v454_v14 = vpop.eup %453 }
 0x18a   :  { %v456_v52 = vpop.eup %455  ;;  %v609_v53 = vmul.f32 %v454_v14, %v93_v25 }
 0x18b   :  { %v458_v54 = vpop.eup %457  ;;  %v611_v55 = vmul.f32 %v456_v52, %v179_v26 }
 0x18c   :  { %v460_v56 = vpop.eup %459  ;;  %v111_v57 = vrot.slane %v609_v53, 4  ;;  %v614_v58 = vmul.f32 %v458_v54, %v261_v27  ;;  %128 = vmax.xlane.f32.xlu1 %v609_v53 }
 0x18d   :  { %v192_v59 = vrot.slane %v611_v55, 4  ;;  %v618_v60 = vmul.f32 %v460_v56, %v343_v39  ;;  %209 = vmax.xlane.f32.xlu0 %v611_v55  ;;  %v44_v56 = vand.u32 127, %v41_v9 }
 0x18e   :  { %v112_v61 = vmax.f32 %v609_v53, %v111_v57  ;;  %v274_v62 = vrot.slane %v614_v58, 4 }
 0x18f   :  { %v193_v63 = vmax.f32 %v611_v55, %v192_v59  ;;  %v356_v0 = vrot.slane %v618_v60, 4 }
 0x190   :  { %v113_v1 = vrot.slane %v112_v61, 2  ;;  %v275_v2 = vmax.f32 %v614_v58, %v274_v62 }
 0x191   :  { %v194_v3 = vrot.slane %v193_v63, 2  ;;  %v357_v4 = vmax.f32 %v618_v60, %v356_v0  ;;  %291 = vmax.xlane.f32.xlu0 %v614_v58 }
 0x192   :  { %v114_v5 = vmax.f32 %v112_v61, %v113_v1  ;;  %v276_v6 = vrot.slane %v275_v2, 2 }
 0x193   :  { %v195_v7 = vmax.f32 %v193_v63, %v194_v3  ;;  %v358_v8 = vrot.slane %v357_v4, 2 }
 0x194   :  { %v115_v12 = vrot.slane %v114_v5, 1  ;;  %v277_v10 = vmax.f32 %v275_v2, %v276_v6 }
 0x195   :  { %v196_v13 = vrot.slane %v195_v7, 1  ;;  %v359_v15 = vmax.f32 %v357_v4, %v358_v8  ;;  %373 = vmax.xlane.f32.xlu0 %v618_v60 }
 0x196   :  { %v116_v16 = vmax.f32 %v114_v5, %v115_v12  ;;  %v278_v17 = vrot.slane %v277_v10, 1 }
 0x197   :  { %v197_v18 = vmax.f32 %v195_v7, %v196_v13  ;;  %v360_v19 = vrot.slane %v359_v15, 1 }
 0x198   :  { %vm117_vm3 = vcmp.ge.f32.partialorder %v609_v53, %v116_v16  ;;  %v279_v20 = vmax.f32 %v277_v10, %v278_v17 }
 0x199   :  { %v118_v21 = vsel %vm117_vm3, %v552_v11, 8  ;;  %vm198_vm4 = vcmp.ge.f32.partialorder %v611_v55, %v197_v18  ;;  %v361_v31 = vmax.f32 %v359_v15, %v360_v19  ;;  %v398_v32 = vsel %vm397_vm0, %v116_v16, %v197_v18 }
 0x19a   :  { %v119_v33 = vrot.slane %v118_v21, 4  ;;  %v199_v34 = vsel %vm198_vm4, %v552_v11, 8  ;;  %vm280_vm5 = vcmp.ge.f32.partialorder %v614_v58, %v279_v20  ;;  %v400_v38 = vsel %vm399_vm1, %v398_v32, %v279_v20 }
 0x19b   :  { %v200_v22 = vrot.slane %v199_v34, 4  ;;  %v281_v23 = vsel %vm280_vm5, %v552_v11, 8  ;;  %vm362_vm6 = vcmp.ge.f32.partialorder %v618_v60, %v361_v31  ;;  %v402_v28 = vsel %vm401_vm2, %v400_v38, %v361_v31 }
 0x19c   :  { %vm120_vm7 = vcmp.lt.s32.totalorder %v118_v21, %v119_v33  ;;  %v282_v29 = vrot.slane %v281_v23, 4  ;;  %v363_v30 = vsel %vm362_vm6, %v552_v11, 8  ;;  %403 = vst [vmem:[%s716_s2] sm:$0xf] %v402_v28 }
 0x19d   :  { %v121_v35 = vsel %vm120_vm7, %v118_v21, %v119_v33  ;;  %vm201_vm8 = vcmp.lt.s32.totalorder %v199_v34, %v200_v22  ;;  %v364_v36 = vrot.slane %v363_v30, 4 }
 0x19e   :  { %v122_v37 = vrot.slane %v121_v35, 2  ;;  %v202_v24 = vsel %vm201_vm8, %v199_v34, %v200_v22  ;;  %vm283_vm9 = vcmp.lt.s32.totalorder %v281_v23, %v282_v29 }
 0x19f   :  { %v203_v25 = vrot.slane %v202_v24, 2  ;;  %v284_v26 = vsel %vm283_vm9, %v281_v23, %v282_v29  ;;  %vm365_vm10 = vcmp.lt.s32.totalorder %v363_v30, %v364_v36 }
 0x1a0   :  { %vm123_vm11 = vcmp.lt.s32.totalorder %v121_v35, %v122_v37  ;;  %v285_v27 = vrot.slane %v284_v26, 2  ;;  %v366_v39 = vsel %vm365_vm10, %v363_v30, %v364_v36 }
 0x1a1   :  { %v124_v40 = vsel %vm123_vm11, %v121_v35, %v122_v37  ;;  %vm204_vm12 = vcmp.lt.s32.totalorder %v202_v24, %v203_v25  ;;  %v367_v41 = vrot.slane %v366_v39, 2 }
 0x1a2   :  { %v125_v11 = vrot.slane %v124_v40, 1  ;;  %v205_v42 = vsel %vm204_vm12, %v202_v24, %v203_v25  ;;  %vm286_vm13 = vcmp.lt.s32.totalorder %v284_v26, %v285_v27 }
 0x1a3   :  { %v206_v43 = vrot.slane %v205_v42, 1  ;;  %v287_v44 = vsel %vm286_vm13, %v284_v26, %v285_v27  ;;  %vm368_vm14 = vcmp.lt.s32.totalorder %v366_v39, %v367_v41 }
 0x1a4   :  { %vm126_vm15 = vcmp.lt.s32.totalorder %v124_v40, %v125_v11  ;;  %v288_v45 = vrot.slane %v287_v44, 1  ;;  %v369_v46 = vsel %vm368_vm14, %v366_v39, %v367_v41 }
 0x1a5   :  { %v127_v47 = vsel %vm126_vm15, %v124_v40, %v125_v11  ;;  %vm207_vm3 = vcmp.lt.s32.totalorder %v205_v42, %v206_v43  ;;  %v370_v48 = vrot.slane %v369_v46, 1 }
 0x1a6   :  { %v208_v49 = vsel %vm207_vm3, %v205_v42, %v206_v43  ;;  %vm289_vm4 = vcmp.lt.s32.totalorder %v287_v44, %v288_v45 }
 0x1a7   :  { %v290_v50 = vsel %vm289_vm4, %v287_v44, %v288_v45  ;;  %vm371_vm5 = vcmp.lt.s32.totalorder %v369_v46, %v370_v48  ;;  %v404_v51 = vsel %vm397_vm0, %v127_v47, %v208_v49 }
 0x1a8   :  { %v372_v14 = vsel %vm371_vm5, %v369_v46, %v370_v48  ;;  %v405_v52 = vsel %vm399_vm1, %v404_v51, %v290_v50 }
 0x1a9   :  { %v406_v54 = vsel %vm401_vm2, %v405_v52, %v372_v14 }
 0x1aa   :  { %407 = vst [vmem:[%s717_s3] sm:$0xf] %v406_v54  ;;  %s514_s3 = smov [#allocation5]  }
 0x1ab   :  { %s420_s30 = sshll.u32 %s514_s3, 4  ;;  %s421_s30 = int_to_ptr.vmem [resolvable:$true] %s420_s30 }
 0x1ac   :  { %s481_s6 = scalar_lea.vmem %s421_s30, 128  ;;  %p486_p6 = scmp.lt.s32.totalorder %s421_s30, %s421_s30 }
 0x1ad   :  { %p482_p5 = scmp.ne.s32.totalorder %s421_s30, %s481_s6  ;;  %p487_p7 = scmp.lt.s32.totalorder %s481_s6, %s481_s6 }
 0x1af   :  { %p488_p8 = por %p487_p7, %p486_p6 }
 0x1b1   :  { %p489_p9 = pnand %p488_p8, %p482_p5 }
 0x215   :  { %v650_v57 = vpop.xlane.xlu1 %128 }
 0x216   :  { %v652_v59 = vpop.xlane.xlu0 %209  ;;  %vm130_vm6 = vcmp.ge.f32.partialorder %v609_v53, %v650_v57  ;;  %vm148_vm0 = vcmp.gt.f32.partialorder %v650_v57, -1.0 }
 0x217   :  { %vm211_vm1 = vcmp.ge.f32.partialorder %v611_v55, %v652_v59  ;;  %v662_v61 = vsel %vm148_vm0, %v650_v57, -1.0  ;;  %v131_v62 = vsel %vm130_vm6, %v44_v56, 128 }
 0x218   :  { %vm230_vm2 = vcmp.gt.f32.partialorder %v652_v59, %v662_v61  ;;  %v212_v9 = vsel %vm211_vm1, %v44_v56, 128  ;;  %v133_v63 = vshra.s32 %v131_v62, 16  ;;  %v132_v13 = vand.u32 65535, %v131_v62 }
 0x219   :  { %v671_v53 = vsel %vm230_vm2, %v652_v59, %v662_v61  ;;  %v214_v0 = vshra.s32 %v212_v9, 16  ;;  %v213_v15 = vand.u32 65535, %v212_v9 }
 0x21a   :  { %v673_v55 = vpop.xlane.xlu0 %291  ;;  %v135_v1 = vcvt.s32.f32 %v133_v63 }
 0x21b   :  { %vm293_vm7 = vcmp.ge.f32.partialorder %v614_v58, %v673_v55  ;;  %vm312_vm8 = vcmp.gt.f32.partialorder %v673_v55, %v671_v53  ;;  %v216_v2 = vcvt.s32.f32 %v214_v0  ;;  %v215_v18 = vcvt.s32.f32 %v213_v15 }
 0x21c   :  { %136 = vmin.xlane.f32.xlu0 %v135_v1  ;;  %v294_v3 = vsel %vm293_vm7, %v44_v56, 128  ;;  %v684_v5 = vsel %vm312_vm8, %v673_v55, %v671_v53 }
 0x21d   :  { %217 = vmin.xlane.f32.xlu1 %v216_v2  ;;  %v296_v4 = vshra.s32 %v294_v3, 16  ;;  %v295_v19 = vand.u32 65535, %v294_v3 }
 0x21e   :  { %v686_v6 = vpop.xlane.xlu0 %373 }
 0x21f   :  { %vm375_vm9 = vcmp.ge.f32.partialorder %v618_v60, %v686_v6  ;;  %vm394_vm10 = vcmp.gt.f32.partialorder %v686_v6, %v684_v5  ;;  %v298_v58 = vcvt.s32.f32 %v296_v4  ;;  %v134_v60 = vcvt.s32.f32 %v132_v13 }
 0x220   :  { %v376_v7 = vsel %vm375_vm9, %v44_v56, 128  ;;  %v396_v8 = vsel %vm394_vm10, %v686_v6, %v684_v5  ;;  %v297_v32 = vcvt.s32.f32 %v295_v19 }
 0x221   :  { %299 = vmin.xlane.f32.xlu1 %v298_v58  ;;  %v378_v12 = vshra.s32 %v376_v7, 16  ;;  %408 = vst [vmem:[#allocation5] sm:$0xff] %v396_v8  ;;  %v377_v33 = vand.u32 65535, %v376_v7 }
 0x223   :  { %v380_v10 = vcvt.s32.f32 %v378_v12  ;;  %v379_v22 = vcvt.s32.f32 %v377_v33 }
 0x225   :  { %381 = vmin.xlane.f32.xlu0 %v380_v10 }
 0x2a5   :  { %v137_v16 = vpop.xlane.xlu0 %136 }
 0x2a6   :  { %v218_v17 = vpop.xlane.xlu1 %217  ;;  %vm138_vm11 = vcmp.eq.f32.partialorder %v135_v1, %v137_v16 }
 0x2a7   :  { %v139_v20 = vsel %vm138_vm11, %v134_v60, inf  ;;  %vm219_vm12 = vcmp.eq.f32.partialorder %v216_v2, %v218_v17 }
 0x2a8   :  { %140 = vmin.xlane.f32.xlu0 %v139_v20  ;;  %v220_v21 = vsel %vm219_vm12, %v215_v18, inf }
 0x2a9   :  { %221 = vmin.xlane.f32.xlu1 %v220_v21 }
 0x2aa   :  { %v300_v31 = vpop.xlane.xlu1 %299 }
 0x2ab   :  { %vm301_vm13 = vcmp.eq.f32.partialorder %v298_v58, %v300_v31 }
 0x2ac   :  { %v302_v34 = vsel %vm301_vm13, %v297_v32, inf }
 0x2ad   :  { %303 = vmin.xlane.f32.xlu1 %v302_v34 }
 0x2ae   :  { %v382_v38 = vpop.xlane.xlu0 %381 }
 0x2af   :  { %vm383_vm14 = vcmp.eq.f32.partialorder %v380_v10, %v382_v38 }
 0x2b0   :  { %v384_v23 = vsel %vm383_vm14, %v379_v22, inf }
 0x2b1   :  { %385 = vmin.xlane.f32.xlu0 %v384_v23 }
 0x2b2   :  { %492 = shalt.err (!%p489_p9)
}
 0x2b3   :  { %423 = dma.vmem_to_hbm [thread:$0]  %s421_s30, 128, %s718_s4, [#allocation4]   ;;  %v143_v28 = vcvt.f32.s32 %v137_v16  ;;  %v224_v29 = vcvt.f32.s32 %v218_v17  ;;  %v306_v25 = vcvt.f32.s32 %v300_v31  ;;  %v388_v42 = vcvt.f32.s32 %v382_v38 }
 0x2b5   :  { %v144_v35 = vshll.u32 %v143_v28, 16  ;;  %v225_v24 = vshll.u32 %v224_v29, 16  ;;  %v307_v11 = vshll.u32 %v306_v25, 16  ;;  %v389_v48 = vshll.u32 %v388_v42, 16 }
 0x331   :  { %v141_v30 = vpop.xlane.xlu0 %140 }
 0x332   :  { %v142_v36 = vcvt.f32.s32 %v141_v30  ;;  %v222_v37 = vpop.xlane.xlu1 %221 }
 0x333   :  { %v223_v26 = vcvt.f32.s32 %v222_v37 }
 0x334   :  { %v145_v27 = vadd.s32 %v144_v35, %v142_v36 }
 0x335   :  { %v226_v39 = vadd.s32 %v225_v24, %v223_v26 }
 0x336   :  { %v149_v40 = vsel %vm148_vm0, %v145_v27, 0  ;;  %v304_v41 = vpop.xlane.xlu1 %303 }
 0x337   :  { %v229_v43 = vadd.s32 128, %v226_v39  ;;  %v305_v44 = vcvt.f32.s32 %v304_v41 }
 0x339   :  { %v231_v45 = vsel %vm230_vm2, %v229_v43, %v149_v40  ;;  %v308_v46 = vadd.s32 %v307_v11, %v305_v44 }
 0x33a   :  { %v386_v47 = vpop.xlane.xlu0 %385 }
 0x33b   :  { %v387_v49 = vcvt.f32.s32 %v386_v47  ;;  %v311_v50 = vadd.s32 256, %v308_v46 }
 0x33d   :  { %v390_v51 = vadd.s32 %v389_v48, %v387_v49  ;;  %v313_v52 = vsel %vm312_vm8, %v311_v50, %v231_v45 }
 0x33f   :  { %v393_v14 = vadd.s32 384, %v390_v51 }
 0x341   :  { %v395_v54 = vsel %vm394_vm10, %v393_v14, %v313_v52 }
 0x342   :  { %409 = vst [vmem:[%s719_s5] sm:$0xff] %v395_v54 }
 0x343   :  { %503 = dma.done.wait [#allocation4], 128  }
 0x344   :  { %504 = vsyncadd [#allocation4], 4294967168 }
 0x345   :  { %435 = vsyncpa [#allocation3], 1 }
 0x346   :  { %436 = vsyncpa [#allocation4], 1 }

// kernel: anchor_target_layer.3
= control target key start
LH: loop header
LB: loop body
LE: loop exit
PB: predicated region body
PF: predicated region fallthrough
CT: control target
= control target key end

     0   :  { %11 = vsyncpa [#allocation3], 0  ;;  %s644_s0 = inlined_call_operand.vmem [shape: f32[8,4], index: 0, kind: input, shape index: {}]   ;;  %s645_s1 = inlined_call_operand.vmem [shape: f32[2,4,128], index: 1, kind: input, shape index: {}]   ;;  %s646_s2 = inlined_call_operand.vmem [shape: f32[4,4,128], index: 2, kind: input, shape index: {}]   ;;  %s647_s3 = inlined_call_operand.vmem [shape: f32[4,4,128], index: 3, kind: input, shape index: {}]   ;;  %s648_s4 = inlined_call_operand.vmem [shape: s32[4,128], index: 4, kind: input, shape index: {}]   ;;  %s649_s5 = inlined_call_operand.vmem [shape: f32[4,128], index: 5, kind: input, shape index: {}]   ;;  %s650_s6 = inlined_call_operand.vmem [shape: f32[8,128], index: 6, kind: output, shape index: {}]  }
   0x1   :  { %s18_s23 = sshll.u32 %s644_s0, 4  ;;  %s19_s23 = int_to_ptr.vmem [resolvable:$true] %s18_s23 }
   0x2   :  { %s413_s24 = scalar_lea.vmem %s19_s23, 128  ;;  %p418_p1 = scmp.lt.s32.totalorder %s19_s23, %s19_s23 }
   0x3   :  { %p414_p0 = scmp.ne.s32.totalorder %s19_s23, %s413_s24  ;;  %p419_p2 = scmp.lt.s32.totalorder %s413_s24, %s413_s24 }
   0x5   :  { %p420_p3 = por %p419_p2, %p418_p1 }
   0x7   :  { %p421_p4 = pnand %p420_p3, %p414_p0 }
   0x9   :  { %424 = shalt.err (!%p421_p4)
}
   0xa   :  { %s427_s25 = smov [#allocation2]  }
   0xb   :  { %21 = dma.vmem_to_smem %s19_s23, 128, %s427_s25, [#allocation3]  }
   0xc   :  { %425 = dma.done.wait [#allocation3], 128  }
   0xd   :  { %426 = vsyncadd [#allocation3], 4294967168 }
   0xe   :  { %35 = sfence }
   0xf   :  { %v343_v0 = vld [vmem:[%s645_s1 + $0x4] sm:$0xf]  ;;  %v42_v1 = vld [vmem:[%s645_s1] sm:$0xf]  ;;  %s87_s7 = sld [smem:[#allocation2]]  ;;  %v428_v8 = vmov 0.0  }
  0x10   :  { %v473_v2 = vsub.f32 %v343_v0, %v42_v1  ;;  %v478_v3 = vld [vmem:[%s648_s4] sm:$0xf]  ;;  %s345_s8 = sld [smem:[#allocation2 + $0x1]]  ;;  %v384_v42 = vld [vmem:[%s647_s3 + $0x8] sm:$0xf]  ;;  %vm54_vm9 = vcmask 1043456  }
  0x11   :  { %s346_s9 = sld [smem:[#allocation2 + $0x2]]  ;;  %vm84_vm0 = vcmp.eq.s32.totalorder %v478_v3, 0  ;;  %vm103_vm1 = vcmp.eq.s32.totalorder %v478_v3, 1  ;;  %v488_v7 = vld [vmem:[%s649_s5] sm:$0xf]  ;;  %vm122_vm2 = vcmp.eq.s32.totalorder %v478_v3, 2 }
  0x12   :  { %v44_v4 = vand.u32 2147483647, %v473_v2  ;;  %s482_s10 = sld [smem:[#allocation2 + $0x3]]  ;;  %v344_v9 = vsel %vm84_vm0, 1.0, %v428_v8  ;;  %v348_v13 = vsel %vm103_vm1, 1.0, %v428_v8  ;;  %vm141_vm3 = vcmp.eq.s32.totalorder %v478_v3, 3 }
  0x13   :  { %s349_s11 = sld [smem:[#allocation2 + $0x80]]  ;;  %v499_v14 = vmax.f32 %v488_v7, 0.0  ;;  %v353_v19 = vsel %vm122_vm2, 1.0, %v428_v8  ;;  %vm160_vm4 = vcmp.eq.s32.totalorder %v478_v3, 4  ;;  %v358_v23 = vsel %vm141_vm3, 1.0, %v428_v8 }
  0x14   :  { %v45_v5 = vsub.f32 0.0, %v44_v4  ;;  %s350_s1 = sld [smem:[#allocation2 + $0x81]]  ;;  %vm179_vm5 = vcmp.eq.s32.totalorder %v478_v3, 5  ;;  %v518_v30 = vsel %vm160_vm4, 1.0, %v428_v8  ;;  %vm198_vm6 = vcmp.eq.s32.totalorder %v478_v3, 6 }
  0x15   :  { %v88_v10 = vstv %s87_s7  ;;  %s351_s4 = sld [smem:[#allocation2 + $0x82]]  ;;  %v528_v37 = vsel %vm179_vm5, 1.0, %v428_v8  ;;  %v536_v41 = vld [vmem:[%s647_s3] sm:$0xf]  ;;  %v547_v46 = vld [vmem:[%s647_s3 + $0x4] sm:$0xf] }
  0x16   :  { %v46_v6 = vmul.f32 1.442695, %v45_v5  ;;  %v92_v11 = vstv %s345_s8  ;;  %s491_s14 = sld [smem:[#allocation2 + $0x83]]  ;;  %v89_v15 = vmul.f32 %v344_v9, %v88_v10  ;;  %v385_v47 = vld [vmem:[%s647_s3 + $0xc] sm:$0xf]  ;;  %vm245_vm7 = vcmp.gt.f32.partialorder %v499_v14, 0.0 }
  0x17   :  { %v96_v12 = vstv %s346_s9  ;;  %s495_s15 = sld [smem:[#allocation2 + $0x100]]  ;;  %v93_v17 = vmul.f32 %v344_v9, %v92_v11  ;;  %v560_v54 = vsub.f32 %v384_v42, %v536_v41  ;;  %v566_v59 = vsub.f32 %v385_v47, %v547_v46 }
  0x18   :  { %401 = vpow2.f32 %v46_v6  ;;  %v100_v16 = vstv %s482_s10  ;;  %s502_s5 = sld [smem:[#allocation2 + $0x101]]  ;;  %v97_v20 = vmul.f32 %v344_v9, %v96_v12  ;;  %v373_v5 = vsel %vm198_vm6, 1.0, %v428_v8 }
  0x19   :  { %v107_v18 = vstv %s349_s11  ;;  %s505_s16 = sld [smem:[#allocation2 + $0x102]]  ;;  %v101_v24 = vmul.f32 %v344_v9, %v100_v16  ;;  %vm217_vm8 = vcmp.eq.s32.totalorder %v478_v3, 7 }
  0x1a   :  { %v108_v21 = vmul.f32 %v348_v13, %v107_v18  ;;  %v111_v22 = vstv %s350_s1  ;;  %s508_s17 = sld [smem:[#allocation2 + $0x103]] }
  0x1b   :  { %v112_v25 = vmul.f32 %v348_v13, %v111_v22  ;;  %v115_v26 = vstv %s351_s4  ;;  %s511_s18 = sld [smem:[#allocation2 + $0x180]] }
  0x1c   :  { %v109_v27 = vadd.f32 %v108_v21, %v89_v15  ;;  %v116_v28 = vmul.f32 %v348_v13, %v115_v26  ;;  %v119_v29 = vstv %s491_s14  ;;  %s515_s19 = sld [smem:[#allocation2 + $0x181]]  ;;  %v246_v15 = vsel %vm245_vm7, %v560_v54, 1.0 }
  0x1d   :  { %v113_v31 = vadd.f32 %v112_v25, %v93_v17  ;;  %v120_v32 = vmul.f32 %v348_v13, %v119_v29  ;;  %v126_v33 = vstv %s495_s15  ;;  %s521_s20 = sld [smem:[#allocation2 + $0x182]] }
  0x1e   :  { %v117_v34 = vadd.f32 %v116_v28, %v97_v20  ;;  %v127_v35 = vmul.f32 %v353_v19, %v126_v33  ;;  %v130_v36 = vstv %s502_s5  ;;  %s525_s21 = sld [smem:[#allocation2 + $0x183]] }
  0x1f   :  { %v121_v38 = vadd.f32 %v120_v32, %v101_v24  ;;  %v131_v39 = vmul.f32 %v353_v19, %v130_v36  ;;  %v134_v40 = vstv %s505_s16  ;;  %s531_s22 = sld [smem:[#allocation2 + $0x200]] }
  0x20   :  { %v128_v43 = vadd.f32 %v127_v35, %v109_v27  ;;  %v135_v44 = vmul.f32 %v353_v19, %v134_v40  ;;  %v138_v45 = vstv %s508_s17  ;;  %s542_s27 = sld [smem:[#allocation2 + $0x201]]  ;;  %v378_v35 = vsel %vm217_vm8, 1.0, %v428_v8 }
  0x21   :  { %v132_v48 = vadd.f32 %v131_v39, %v113_v31  ;;  %v139_v49 = vmul.f32 %v353_v19, %v138_v45  ;;  %v145_v50 = vstv %s511_s18  ;;  %s553_s7 = sld [smem:[#allocation2 + $0x202]]  ;;  %v248_v19 = vsel %vm245_vm7, %v566_v59, 1.0 }
  0x22   :  { %v136_v51 = vadd.f32 %v135_v44, %v117_v34  ;;  %v146_v52 = vmul.f32 %v358_v23, %v145_v50  ;;  %v149_v53 = vstv %s515_s19  ;;  %s557_s8 = sld [smem:[#allocation2 + $0x203]]  ;;  %v67_v40 = vsub.f32 0.0, %v473_v2 }
  0x23   :  { %v140_v56 = vadd.f32 %v139_v49, %v121_v38  ;;  %v150_v57 = vmul.f32 %v358_v23, %v149_v53  ;;  %v153_v58 = vstv %s521_s20  ;;  %s563_s3 = sld [smem:[#allocation2 + $0x280]]  ;;  %v38_v45 = vsub.f32 0.0, %v488_v7 }
  0x24   :  { %v147_v61 = vadd.f32 %v146_v52, %v128_v43  ;;  %v154_v62 = vmul.f32 %v358_v23, %v153_v58  ;;  %v157_v63 = vstv %s525_s21  ;;  %s569_s9 = sld [smem:[#allocation2 + $0x281]]  ;;  %v51_v49 = vmax.f32 %v473_v2, 0.0 }
  0x25   :  { %v402_v55 = vpop.eup %401  ;;  %v151_v0 = vadd.f32 %v150_v57, %v132_v48  ;;  %v158_v1 = vmul.f32 %v358_v23, %v157_v63  ;;  %v164_v4 = vstv %s531_s22  ;;  %s572_s10 = sld [smem:[#allocation2 + $0x282]] }
  0x26   :  { %v48_v60 = vadd.f32 1.0, %v402_v55  ;;  %v155_v6 = vadd.f32 %v154_v62, %v136_v51  ;;  %v165_v9 = vmul.f32 %v518_v30, %v164_v4  ;;  %v168_v10 = vstv %s542_s27  ;;  %s579_s11 = sld [smem:[#allocation2 + $0x283]] }
  0x27   :  { %v159_v11 = vadd.f32 %v158_v1, %v140_v56  ;;  %v169_v12 = vmul.f32 %v518_v30, %v168_v10  ;;  %v172_v13 = vstv %s553_s7  ;;  %s583_s1 = sld [smem:[#allocation2 + $0x300]]  ;;  %v68_v55 = vmax.f32 %v67_v40, 0.0 }
  0x28   :  { %403 = vlog2.f32 %v48_v60  ;;  %v166_v16 = vadd.f32 %v165_v9, %v147_v61  ;;  %v173_v17 = vmul.f32 %v518_v30, %v172_v13  ;;  %v176_v18 = vstv %s557_s8  ;;  %s590_s12 = sld [smem:[#allocation2 + $0x301]] }
  0x29   :  { %v170_v20 = vadd.f32 %v169_v12, %v151_v0  ;;  %v177_v21 = vmul.f32 %v518_v30, %v176_v18  ;;  %v183_v22 = vstv %s563_s3  ;;  %s597_s13 = sld [smem:[#allocation2 + $0x302]]  ;;  %405 = vrcp.f32 %v246_v15 }
  0x2a   :  { %v174_v23 = vadd.f32 %v173_v17, %v155_v6  ;;  %v184_v24 = vmul.f32 %v528_v37, %v183_v22  ;;  %v187_v25 = vstv %s569_s9  ;;  %s377_s4 = sld [smem:[#allocation2 + $0x303]]  ;;  %407 = vrcp.f32 %v248_v19 }
  0x2b   :  { %v178_v26 = vadd.f32 %v177_v21, %v159_v11  ;;  %v188_v27 = vmul.f32 %v528_v37, %v187_v25  ;;  %v191_v28 = vstv %s572_s10  ;;  %s379_s14 = sld [smem:[#allocation2 + $0x380]]  ;;  %v39_v61 = vmax.f32 %v38_v45, 0.0 }
  0x2c   :  { %v185_v29 = vadd.f32 %v184_v24, %v166_v16  ;;  %v192_v30 = vmul.f32 %v528_v37, %v191_v28  ;;  %v195_v31 = vstv %s579_s11  ;;  %s380_s15 = sld [smem:[#allocation2 + $0x381]]  ;;  %v252_v12 = vmul.f32 0.5, %v566_v59 }
  0x2d   :  { %v189_v32 = vadd.f32 %v188_v27, %v170_v20  ;;  %v196_v33 = vmul.f32 %v528_v37, %v195_v31  ;;  %v202_v34 = vstv %s583_s1  ;;  %s381_s5 = sld [smem:[#allocation2 + $0x382]]  ;;  %v387_v31 = vld [vmem:[%s646_s2 + $0x4] sm:$0xf] }
  0x2e   :  { %v193_v36 = vadd.f32 %v192_v30, %v174_v23  ;;  %v203_v38 = vmul.f32 %v373_v5, %v202_v34  ;;  %v206_v39 = vstv %s590_s12  ;;  %s382_s16 = sld [smem:[#allocation2 + $0x383]] }
  0x2f   :  { %v197_v42 = vadd.f32 %v196_v33, %v178_v26  ;;  %v207_v43 = vmul.f32 %v373_v5, %v206_v39  ;;  %v210_v44 = vstv %s597_s13 }
  0x30   :  { %v204_v47 = vadd.f32 %v203_v38, %v185_v29  ;;  %v211_v48 = vmul.f32 %v373_v5, %v210_v44  ;;  %v214_v37 = vstv %s377_s4 }
  0x31   :  { %v208_v50 = vadd.f32 %v207_v43, %v189_v32  ;;  %v215_v3 = vmul.f32 %v373_v5, %v214_v37  ;;  %v221_v8 = vstv %s379_s14  ;;  %v250_v5 = vmul.f32 0.5, %v560_v54  ;;  %v389_v43 = vld [vmem:[%s646_s2 + $0x8] sm:$0xf] }
  0x32   :  { %v212_v51 = vadd.f32 %v211_v48, %v193_v36  ;;  %v222_v52 = vmul.f32 %v378_v35, %v221_v8  ;;  %v225_v53 = vstv %s380_s15  ;;  %v253_v54 = vadd.f32 %v547_v46, %v252_v12  ;;  %v272_v46 = vld [vmem:[%s646_s2] sm:$0xf] }
  0x33   :  { %v216_v57 = vadd.f32 %v215_v3, %v197_v42  ;;  %v226_v58 = vmul.f32 %v378_v35, %v225_v53  ;;  %v229_v60 = vstv %s381_s5  ;;  %v251_v20 = vadd.f32 %v250_v5, %v536_v41 }
  0x34   :  { %v223_v63 = vadd.f32 %v222_v52, %v204_v47  ;;  %v230_v7 = vmul.f32 %v378_v35, %v229_v60  ;;  %v233_v0 = vstv %s382_s16 }
  0x35   :  { %v404_v56 = vpop.eup %403  ;;  %v227_v1 = vadd.f32 %v226_v58, %v208_v50  ;;  %v234_v4 = vmul.f32 %v378_v35, %v233_v0 }
  0x36   :  { %v50_v62 = vmul.f32 0.6931472, %v404_v56  ;;  %v231_v2 = vadd.f32 %v230_v7, %v212_v51  ;;  %v406_v10 = vpop.eup %405 }
  0x37   :  { %v235_v11 = vadd.f32 %v234_v4, %v216_v57  ;;  %v408_v13 = vpop.eup %407 }
  0x38   :  { %v52_v6 = vadd.f32 %v51_v49, %v50_v62  ;;  %v69_v9 = vadd.f32 %v68_v55, %v50_v62  ;;  %v254_v16 = vsub.f32 %v231_v2, %v223_v63  ;;  %v391_v49 = vld [vmem:[%s646_s2 + $0xc] sm:$0xf] }
  0x39   :  { %v255_v18 = vsub.f32 %v235_v11, %v227_v1 }
  0x3a   :  { %v53_v15 = vmul.f32 %v52_v6, %v499_v14  ;;  %v70_v17 = vmul.f32 %v69_v9, %v39_v61  ;;  %v256_v21 = vmul.f32 0.5, %v254_v16  ;;  %v264_v22 = vmul.f32 %v406_v10, %v254_v16 }
  0x3b   :  { %v258_v23 = vmul.f32 0.5, %v255_v18  ;;  %v268_v24 = vmul.f32 %v408_v13, %v255_v18 }
  0x3c   :  { %v55_v19 = vsel %vm54_vm9, %v53_v15, 0.0  ;;  %v257_v25 = vadd.f32 %v256_v21, %v223_v63  ;;  %v265_v59 = vsel %vm245_vm7, %v264_v22, 1.0  ;;  %v71_v26 = vsel %vm54_vm9, %v70_v17, 0.0 }
  0x3d   :  { %56 = vadd.xlane.f32.xlu0 %v55_v19  ;;  %v259_v27 = vadd.f32 %v258_v23, %v227_v1  ;;  %409 = vlog2.f32 %v265_v59  ;;  %v269_v28 = vsel %vm245_vm7, %v268_v24, 1.0 }
  0x3e   :  { %v260_v29 = vsub.f32 %v257_v25, %v251_v20  ;;  %411 = vlog2.f32 %v269_v28 }
  0x3f   :  { %v262_v41 = vsub.f32 %v259_v27, %v253_v54  ;;  %v323_v27 = vlaneseq }
  0x40   :  { %v261_v30 = vmul.f32 %v406_v10, %v260_v29 }
  0x41   :  { %72 = vadd.xlane.f32.xlu0 %v71_v26  ;;  %v263_v32 = vmul.f32 %v408_v13, %v262_v41  ;;  %v324_v28 = vand.u32 127, %v323_v27  ;;  %v326_v29 = vshrl.u32 %v323_v27, 7 }
  0x42   :  { %v273_v33 = vsub.f32 %v272_v46, %v261_v30 }
  0x43   :  { %v282_v34 = vsub.f32 %v387_v31, %v263_v32  ;;  %vm327_vm14 = vcmp.eq.s32.totalorder %v326_v29, 0  ;;  %vm332_vm15 = vcmp.eq.s32.totalorder %v324_v28, 2  ;;  %vm330_vm0 = vcmp.eq.s32.totalorder %v324_v28, 1 }
  0x44   :  { %v274_v35 = vand.u32 2147483647, %v273_v33  ;;  %vm328_vm1 = vcmp.eq.s32.totalorder %v324_v28, 0  ;;  %vm333_vm2 = vmand %vm327_vm14, %vm332_vm15 }
  0x45   :  { %v283_v36 = vand.u32 2147483647, %v282_v34  ;;  %vm331_vm3 = vmand %vm327_vm14, %vm330_vm0 }
  0x46   :  { %v276_v38 = vmul.f32 0.5, %v274_v35  ;;  %v386_v42 = vadd.f32 -0.5, %v274_v35  ;;  %vm275_vm10 = vcmp.lt.f32.partialorder %v274_v35, 1.0  ;;  %vm329_vm4 = vmand %vm327_vm14, %vm328_vm1 }
  0x47   :  { %v285_v39 = vmul.f32 0.5, %v283_v36  ;;  %v388_v37 = vadd.f32 -0.5, %v283_v36  ;;  %vm284_vm11 = vcmp.lt.f32.partialorder %v283_v36, 1.0 }
  0x48   :  { %v277_v47 = vmul.f32 %v276_v38, %v274_v35 }
  0x49   :  { %v286_v48 = vmul.f32 %v285_v39, %v283_v36 }
  0x4a   :  { %v410_v40 = vpop.eup %409  ;;  %v279_v51 = vsel %vm275_vm10, %v277_v47, %v386_v42 }
  0x4b   :  { %v412_v44 = vpop.eup %411  ;;  %v267_v45 = vmul.f32 0.6931472, %v410_v40  ;;  %v288_v52 = vsel %vm284_vm11, %v286_v48, %v388_v37 }
  0x4c   :  { %v271_v50 = vmul.f32 0.6931472, %v412_v44  ;;  %v289_v58 = vadd.f32 %v288_v52, %v279_v51 }
  0x4d   :  { %v292_v3 = vsub.f32 %v389_v43, %v267_v45 }
  0x4e   :  { %v302_v8 = vsub.f32 %v391_v49, %v271_v50 }
  0x4f   :  { %v293_v53 = vand.u32 2147483647, %v292_v3 }
  0x50   :  { %v303_v55 = vand.u32 2147483647, %v302_v8 }
  0x51   :  { %v295_v56 = vmul.f32 0.5, %v293_v53  ;;  %v390_v57 = vadd.f32 -0.5, %v293_v53  ;;  %vm294_vm12 = vcmp.lt.f32.partialorder %v293_v53, 1.0 }
  0x52   :  { %v305_v60 = vmul.f32 0.5, %v303_v55  ;;  %v392_v61 = vadd.f32 -0.5, %v303_v55  ;;  %vm304_vm13 = vcmp.lt.f32.partialorder %v303_v55, 1.0 }
  0x53   :  { %v296_v62 = vmul.f32 %v295_v56, %v293_v53 }
  0x54   :  { %v306_v63 = vmul.f32 %v305_v60, %v303_v55 }
  0x55   :  { %v298_v7 = vsel %vm294_vm12, %v296_v62, %v390_v57 }
  0x56   :  { %v299_v0 = vadd.f32 %v298_v7, %v289_v58  ;;  %v308_v1 = vsel %vm304_vm13, %v306_v63, %v392_v61 }
  0x58   :  { %v309_v4 = vadd.f32 %v308_v1, %v299_v0 }
  0x5a   :  { %v310_v6 = vmul.f32 %v309_v4, %v499_v14 }
  0x5c   :  { %v311_v2 = vsel %vm54_vm9, %v310_v6, 0.0 }
  0x5d   :  { %312 = vadd.xlane.f32.xlu1 %v311_v2 }
  0xc6   :  { %v57_v5 = vpop.xlane.xlu0 %56 }
  0xc7   :  { %v58_v9 = vrot.slane %v57_v5, 4 }
  0xc9   :  { %v59_v10 = vadd.f32 %v58_v9, %v57_v5 }
  0xca   :  { %v73_v11 = vpop.xlane.xlu0 %72 }
  0xcb   :  { %v60_v12 = vrot.slane %v59_v10, 2  ;;  %v74_v13 = vrot.slane %v73_v11, 4 }
  0xcd   :  { %v75_v15 = vadd.f32 %v74_v13, %v73_v11  ;;  %v61_v16 = vadd.f32 %v60_v12, %v59_v10 }
  0xcf   :  { %v76_v17 = vrot.slane %v75_v15, 2  ;;  %v62_v18 = vrot.slane %v61_v16, 1 }
  0xd1   :  { %v77_v19 = vadd.f32 %v76_v17, %v75_v15  ;;  %v63_v20 = vadd.f32 %v62_v18, %v61_v16 }
  0xd3   :  { %393 = vpush %v63_v20  ;;  %v78_v21 = vrot.slane %v77_v19, 1 }
  0xd5   :  { %v79_v22 = vadd.f32 %v78_v21, %v77_v19 }
  0xd7   :  { %395 = vpush %v79_v22 }
  0xe6   :  { %v313_v14 = vpop.xlane.xlu1 %312 }
  0xe7   :  { %v314_v54 = vrot.slane %v313_v14, 4 }
  0xe9   :  { %v315_v23 = vadd.f32 %v314_v54, %v313_v14 }
  0xeb   :  { %v316_v24 = vrot.slane %v315_v23, 2 }
  0xed   :  { %v317_v25 = vadd.f32 %v316_v24, %v315_v23 }
  0xef   :  { %v318_v59 = vrot.slane %v317_v25, 1 }
  0xf1   :  { %v319_v26 = vadd.f32 %v318_v59, %v317_v25 }
  0xf3   :  { %397 = vpush %v319_v26 }
 0x104   :  { %s394_s2 = spop %393 }
 0x105   :  { %v65_v31 = vstv %s394_s2 }
 0x108   :  { %s396_s25 = spop %395 }
 0x109   :  { %v81_v46 = vstv %s396_s25 }
 0x124   :  { %s398_s26 = spop %397 }
 0x125   :  { %v321_v41 = vstv %s398_s26 }
 0x126   :  { %v334_v30 = vsel %vm333_vm2, %v321_v41, 0.0 }
 0x127   :  { %v335_v32 = vsel %vm331_vm3, %v81_v46, %v334_v30 }
 0x128   :  { %v336_v33 = vsel %vm329_vm4, %v65_v31, %v335_v32 }
 0x129   :  { %337 = vst [vmem:[%s650_s6] sm:$0xff] %v336_v33 }
 0x12a   :  { %342 = vsyncpa [#allocation3], 1 }

</bundles_post_ra>
